<compile_context>
chip_gen: v7x
topology: tpu7x:2x2x1
jax: 0.10.0
libtpu: 0.0.40
codegen_flags: <defaults>
</compile_context>

<pallas_src>
import jax
import jax.numpy as jnp
from jax.experimental import pallas as pl
from jax.experimental.pallas import tpu as pltpu

# fixed VFE-V2 geometry
T, C0 = 8, 4          # points per voxel, raw point features (x, y, z, r)
U1, U2, U3 = 16, 64, 128


# ------------------------------ Pallas kernel ------------------------------

def vfe_v2_kernel(feat_ref, nvox_ref,
                  w1_ref, w2a_ref, w2b_ref, w3a_ref, w3b_ref,
                  b1_ref, b2_ref, b3_ref, out_ref):
    f32, bf16 = jnp.float32, jnp.bfloat16

    feat = feat_ref[...]                                    # [BN, T*C0]  bf16
    nvox = nvox_ref[...]                                    # [BN, 1]     int32
    inv_n = pl.reciprocal(jnp.maximum(nvox.astype(f32), 1.0), approx=True)

    # ---- VFE layer 1 -------------------------------------------------------
    #   d1[:, :128] = block-diag term   feat_t @ (w1_eff * s1)        (per point)
    #   d1[:, 128:] = -(sum_t xyz_t) @ (w1b * s1), tiled over the T groups
    d1 = jnp.dot(feat, w1_ref[...], preferred_element_type=f32)       # [BN, 256]
    pre1 = d1[:, :T * U1] + d1[:, T * U1:] * inv_n                    # [BN, 128]
    h1f = jnp.maximum(pre1 + b1_ref[...], 0.0)                        # [BN, 128]
    # agg1 (max over the T points) replicated into every 16-lane group (XLU rolls)
    r1f = jnp.maximum(h1f, pltpu.roll(h1f, 64, axis=1))
    r1f = jnp.maximum(r1f, pltpu.roll(r1f, 32, axis=1))
    r1f = jnp.maximum(r1f, pltpu.roll(r1f, 16, axis=1))
    h1 = h1f.astype(bf16)
    r1 = r1f.astype(bf16)

    # ---- VFE layer 2 -------------------------------------------------------
    d2 = (jnp.dot(h1, w2a_ref[...], preferred_element_type=f32) +
          jnp.dot(r1, w2b_ref[...], preferred_element_type=f32))      # [BN, 512]
    lane2 = jax.lax.broadcasted_iota(jnp.int32, (1, T * U2), 1)
    ok2 = lane2 < nvox * U2                                           # [BN, 512]
    h2f = jnp.maximum(jnp.where(ok2, d2, 0.0) + b2_ref[...], 0.0)     # [BN, 512]
    h2 = h2f.astype(bf16)
    # agg2 replicated into both 64-lane halves of a 128-lane row
    m = jnp.maximum(h2f[:, :256], h2f[:, 256:])                       # [BN, 256]
    m = jnp.maximum(m[:, :128], m[:, 128:])                           # [BN, 128]
    m = jnp.maximum(m, pltpu.roll(m, 64, axis=1))
    r2 = m.astype(bf16)

    # ---- final linear + BN + relu + mask + max over points -------------------
    d3 = jnp.dot(h2, w3a_ref[...], preferred_element_type=f32)        # [BN, 1024]
    lane3 = jax.lax.broadcasted_iota(jnp.int32, (1, T * U3), 1)
    ok3 = lane3 < nvox * U3
    z = jnp.where(ok3, d3, -jnp.inf)
    z = jnp.maximum(z[:, :512], z[:, 512:])
    z = jnp.maximum(z[:, :256], z[:, 256:])
    z = jnp.maximum(z[:, :128], z[:, 128:])                           # [BN, 128]
    # t-independent (agg2 @ w3b * s3) term + bias, hoisted out of the max over T
    g = jnp.dot(r2, w3b_ref[...], preferred_element_type=f32)         # [BN, 128]
    out_ref[...] = jnp.maximum(z + g + b3_ref[...], 0.0)


# ------------------------------ host wrapper -------------------------------

def _round_up(a, b):
    return ((a + b - 1) // b) * b


def _vmem_capacity_bytes():
    try:
        return int(pltpu.get_tpu_info().vmem_capacity_bytes)
    except Exception:
        return 64 * 1024 * 1024   # conservative (v7x-like) fallback


def _pack_kernel_params(params):
    """Fold BN scales + the concat structure into lane-dense block weights."""
    f32, bf16 = jnp.float32, jnp.bfloat16
    w1 = params["w1"].astype(f32)                        # [7, 16]
    w2 = params["w2"].astype(f32)                        # [32, 64]
    w3 = params["w3"].astype(f32)                        # [128, 128]
    s1 = params["s1"].reshape(-1).astype(f32)
    s2 = params["s2"].reshape(-1).astype(f32)
    s3 = params["s3"].reshape(-1).astype(f32)
    b1 = params["b1"].reshape(1, -1).astype(f32)
    b2 = params["b2"].reshape(1, -1).astype(f32)
    b3 = params["b3"].reshape(1, -1).astype(f32)

    eye = jnp.eye(T, dtype=f32)

    # layer 1: concat([feat, xyz - mean]) @ w1 == feat @ w1_eff - mean @ w1b
    w1_eff = w1[:C0].at[:3].add(w1[C0:C0 + 3])           # [4, 16]
    w1b = w1[C0:C0 + 3]                                  # [3, 16]
    w1a_s = w1_eff * s1[None, :]
    w1b_s = jnp.concatenate([-(w1b * s1[None, :]), jnp.zeros((1, U1), f32)], axis=0)
    W1A = jnp.kron(eye, w1a_s)                           # [32, 128] block-diag
    W1SUM = jnp.kron(jnp.ones((T, T), f32), w1b_s)       # [32, 128] sum over T, tiled
    W1CAT = jnp.concatenate([W1A, W1SUM], axis=1)        # [32, 256]

    # layer 2: concat([h1, agg1]) @ w2 == h1 @ w2a + agg1 @ w2b
    w2a_s = w2[:U1] * s2[None, :]                        # [16, 64]
    w2b_s = w2[U1:] * s2[None, :]                        # [16, 64]
    W2A = jnp.kron(eye, w2a_s)                           # [128, 512]
    W2B = jnp.concatenate([jnp.kron(jnp.ones((1, T), f32), w2b_s),
                           jnp.zeros((T * U1 - U1, T * U2), f32)], axis=0)  # [128,512]

    # layer 3: concat([h2, agg2]) @ w3 == h2 @ w3a + agg2 @ w3b
    w3a_s = w3[:U2] * s3[None, :]                        # [64, 128]
    w3b_s = w3[U2:] * s3[None, :]                        # [64, 128]
    W3A = jnp.kron(eye, w3a_s)                           # [512, 1024]
    W3B = jnp.concatenate([w3b_s, jnp.zeros((U3 - U2, U3), f32)], axis=0)   # [128,128]

    b1r = jnp.tile(b1, (1, T))                           # [1, 128]
    b2r = jnp.tile(b2, (1, T))                           # [1, 512]
    b3r = b3                                             # [1, 128]

    return [W1CAT.astype(bf16), W2A.astype(bf16), W2B.astype(bf16),
            W3A.astype(bf16), W3B.astype(bf16), b1r, b2r, b3r]


def voxel_feature_extractor_v2(features, num_voxels, coors, params, *, block_n=None):
    """VFE-V2 forward. block_n is chosen per TPU generation when not given."""
    del coors  # accepted for API parity with the PyTorch module; unused in forward
    N, T_, C0_ = features.shape
    assert (T_, C0_) == (T, C0)

    vmem_cap = _vmem_capacity_bytes()
    if block_n is None:
        block_n = 2048 if vmem_cap >= 100 * 1024 * 1024 else 1024
    block_n = _round_up(max(32, min(block_n, _round_up(N, 32))), 32)
    Np = _round_up(N, block_n)
    vmem_limit = int(max(32 * 1024 * 1024,
                         min(vmem_cap * 3 // 4, 96 * 1024 * 1024)))

    feat2d = features.reshape(N, T * C0).astype(jnp.bfloat16)   # lane-dense input
    nvox2d = num_voxels.astype(jnp.int32).reshape(N, 1)
    if Np != N:
        feat2d = jnp.pad(feat2d, ((0, Np - N), (0, 0)))
        nvox2d = jnp.pad(nvox2d, ((0, Np - N), (0, 0)))          # padded voxels: 0

    wparams = _pack_kernel_params(params)

    grid = (Np // block_n,)
    in_specs = [pl.BlockSpec((block_n, T * C0), lambda i: (i, 0)),   # features tile
                pl.BlockSpec((block_n, 1), lambda i: (i, 0))]        # num_voxels tile
    in_specs += [pl.BlockSpec(w.shape, lambda i: (0, 0)) for w in wparams]
    out_specs = pl.BlockSpec((block_n, U3), lambda i: (i, 0))

    flops = 2 * Np * (32 * 256 + 2 * 128 * 512 + 512 * 1024 + 128 * 128)
    bytes_acc = Np * (T * C0 * 2 + 4 + U3 * 4) \
        + sum(int(w.size) * w.dtype.itemsize for w in wparams)

    out = pl.pallas_call(
        vfe_v2_kernel,
        out_shape=jax.ShapeDtypeStruct((Np, U3), jnp.float32),
        grid_spec=pltpu.PrefetchScalarGridSpec(
            num_scalar_prefetch=0,
            grid=grid,
            in_specs=in_specs,
            out_specs=out_specs,
        ),
        compiler_params=pltpu.CompilerParams(
            dimension_semantics=("parallel",),
            vmem_limit_bytes=vmem_limit,
        ),
        cost_estimate=pl.CostEstimate(
            flops=int(flops), transcendentals=int(Np),
            bytes_accessed=int(bytes_acc)),
    )(feat2d, nvox2d, *wparams)
    return out[:N]


# ------------------------- parameter construction --------------------------

def make_params(key):
    ks = jax.random.split(key, 12)
    eps = 1e-3

    def bn_fold(kg, kb, km, kv, units):
        gamma = jax.random.uniform(kg, (units,), jnp.float32, 0.5, 1.5)
        beta = 0.1 * jax.random.normal(kb, (units,), jnp.float32)
        rmean = 0.1 * jax.random.normal(km, (units,), jnp.float32)
        rvar = jax.random.uniform(kv, (units,), jnp.float32, 0.5, 1.5)
        scale = gamma / jnp.sqrt(rvar + eps)
        shift = beta - rmean * scale
        return scale.reshape(1, units), shift.reshape(1, units)

    s1, b1 = bn_fold(ks[3], ks[4], ks[5], ks[6], 16)
    s2, b2 = bn_fold(ks[7], ks[8], ks[9], ks[6], 64)
    s3, b3 = bn_fold(ks[10], ks[11], ks[5], ks[9], 128)
    return {
        # nn.Linear weights stored as [in, out] (transpose of torch layout)
        "w1": 0.1 * jax.random.normal(ks[0], (7, 16), jnp.float32),
        "w2": 0.1 * jax.random.normal(ks[1], (32, 64), jnp.float32),
        "w3": 0.1 * jax.random.normal(ks[2], (128, 128), jnp.float32),
        "s1": s1, "b1": b1, "s2": s2, "b2": b2, "s3": s3, "b3": b3,
    }


# --------------------------- pure-JAX reference ----------------------------

def ref_forward(features, num_voxels, params):
    """Faithful f32 reference of the PyTorch module (same div-by-zero guard)."""
    N, T_, _ = features.shape
    nv = jnp.maximum(num_voxels.astype(jnp.float32), 1.0).reshape(N, 1, 1)
    xyz = features[:, :, :3]
    mean = xyz.sum(axis=1, keepdims=True) / nv
    x = jnp.concatenate([features, xyz - mean], axis=2)
    mask = (num_voxels[:, None] > jnp.arange(T_)[None, :]
            ).astype(jnp.float32)[:, :, None]

    def vfe(x, w, s, b):
        h = jnp.maximum(x @ w * s + b, 0.0)
        agg = jnp.max(h, axis=1, keepdims=True)
        return jnp.concatenate([h, jnp.broadcast_to(agg, h.shape)], axis=2)

    x = vfe(x, params["w1"], params["s1"], params["b1"]) * mask
    x = vfe(x, params["w2"], params["s2"], params["b2"]) * mask
    h = jnp.maximum(x @ params["w3"] * params["s3"] + params["b3"], 0.0) * mask
    return jnp.max(h, axis=1)


# ----------------------------------- test -----------------------------------

if __name__ == "__main__":
    key = jax.random.PRNGKey(0)
    kf, kn, kp, kf2, kn2, kf3, kn3 = jax.random.split(key, 7)
    params = make_params(kp)

    def run_case(kfeat, knum, N, block_n=None):
        features = jax.random.normal(kfeat, (N, T, C0), jnp.float32)
        num_voxels = jax.random.randint(knum, (N,), 1, T + 1, dtype=jnp.int32)
        # zero the padded point slots, as the real voxelization pipeline does
        features = features * (jnp.arange(T)[None, :, None]
                               < num_voxels[:, None, None]).astype(jnp.float32)
        coors = jnp.zeros((N, 4), jnp.int32)  # unused by forward
        out = voxel_feature_extractor_v2(features, num_voxels, coors, params,
                                         block_n=block_n)
        out = jax.block_until_ready(out)
        ref = ref_forward(features, num_voxels, params)
        assert out.shape == (N, U3)
        err = float(jnp.max(jnp.abs(out - ref)))
        # Tolerance accounts for bf16 inputs / activations (f32 MXU accumulation).
        assert jnp.allclose(out, ref, atol=5e-2, rtol=5e-2), \
            f"mismatch vs reference (N={N}), max_abs_err={err}"

    run_case(kf, kn, N=16)                  # single-tile path
    run_case(kf2, kn2, N=20)                # host-side padding path
    run_case(kf3, kn3, N=200, block_n=64)   # multi-step grid / pipelined path

    print("KERNEL_OK")
</pallas_src>

<mosaic_0001>
module attributes {stable_mosaic.version = 11 : i64} {
  func.func @vfe_v2_kernel(%arg0: i32, %arg1: memref<32x32xbf16, #tpu.memory_space<vmem>>, %arg2: memref<32x1xi32, #tpu.memory_space<vmem>>, %arg3: memref<32x256xbf16, #tpu.memory_space<vmem>>, %arg4: memref<128x512xbf16, #tpu.memory_space<vmem>>, %arg5: memref<128x512xbf16, #tpu.memory_space<vmem>>, %arg6: memref<512x1024xbf16, #tpu.memory_space<vmem>>, %arg7: memref<128x128xbf16, #tpu.memory_space<vmem>>, %arg8: memref<1x128xf32, #tpu.memory_space<vmem>>, %arg9: memref<1x512xf32, #tpu.memory_space<vmem>>, %arg10: memref<1x128xf32, #tpu.memory_space<vmem>>, %arg11: memref<32x128xf32, #tpu.memory_space<vmem>>) attributes {dimension_semantics = [#tpu.dimension_semantics<parallel>], iteration_bounds = array<i64: 1>, scalar_prefetch = 0 : i64, scratch_operands = 0 : i64, tpu.core_type = #tpu.core_type<tc>, window_params = [{transform_indices = @transform_0, window_bounds = array<i64: 32, 32>}, {transform_indices = @transform_1, window_bounds = array<i64: 32, 1>}, {pipeline_mode = #tpu.pipeline_mode<synchronous>, transform_indices = @transform_2, window_bounds = array<i64: 32, 256>}, {pipeline_mode = #tpu.pipeline_mode<synchronous>, transform_indices = @transform_3, window_bounds = array<i64: 128, 512>}, {pipeline_mode = #tpu.pipeline_mode<synchronous>, transform_indices = @transform_4, window_bounds = array<i64: 128, 512>}, {pipeline_mode = #tpu.pipeline_mode<synchronous>, transform_indices = @transform_5, window_bounds = array<i64: 512, 1024>}, {pipeline_mode = #tpu.pipeline_mode<synchronous>, transform_indices = @transform_6, window_bounds = array<i64: 128, 128>}, {pipeline_mode = #tpu.pipeline_mode<synchronous>, transform_indices = @transform_7, window_bounds = array<i64: 1, 128>}, {pipeline_mode = #tpu.pipeline_mode<synchronous>, transform_indices = @transform_8, window_bounds = array<i64: 1, 512>}, {pipeline_mode = #tpu.pipeline_mode<synchronous>, transform_indices = @transform_9, window_bounds = array<i64: 1, 128>}, {transform_indices = @transform_10, window_bounds = array<i64: 32, 128>}]} {
    %c0 = arith.constant 0 : index
    %c0_0 = arith.constant 0 : index
    %0 = vector.load %arg1[%c0, %c0_0] : memref<32x32xbf16, #tpu.memory_space<vmem>>, vector<32x32xbf16>
    %c0_1 = arith.constant 0 : index
    %c0_2 = arith.constant 0 : index
    %1 = vector.load %arg2[%c0_1, %c0_2] : memref<32x1xi32, #tpu.memory_space<vmem>>, vector<32x1xi32>
    %2 = arith.sitofp %1 : vector<32x1xi32> to vector<32x1xf32>
    %cst = arith.constant 1.000000e+00 : f32
    %3 = vector.broadcast %cst : f32 to vector<32x1xf32>
    %4 = arith.maximumf %2, %3 : vector<32x1xf32>
    %5 = tpu.reciprocal %4 {approx = true} : vector<32x1xf32> -> vector<32x1xf32>
    %c0_3 = arith.constant 0 : index
    %c0_4 = arith.constant 0 : index
    %6 = vector.load %arg3[%c0_3, %c0_4] : memref<32x256xbf16, #tpu.memory_space<vmem>>, vector<32x256xbf16>
    %cst_5 = arith.constant dense<0.000000e+00> : vector<32x256xf32>
    %7 = tpu.matmul %0, %6, %cst_5 {dimension_numbers = #tpu.dot_dimension_numbers<[1], [0], [0], [1], [0, 0, 1, 1], [], []>} : vector<32x32xbf16>, vector<32x256xbf16>, vector<32x256xf32> -> vector<32x256xf32>
    %8 = vector.extract_strided_slice %7 {offsets = [0, 0], sizes = [32, 128], strides = [1, 1]} : vector<32x256xf32> to vector<32x128xf32>
    %9 = vector.extract_strided_slice %7 {offsets = [0, 128], sizes = [32, 128], strides = [1, 1]} : vector<32x256xf32> to vector<32x128xf32>
    %10 = vector.broadcast %5 : vector<32x1xf32> to vector<32x128xf32>
    %11 = arith.mulf %9, %10 : vector<32x128xf32>
    %12 = arith.addf %8, %11 : vector<32x128xf32>
    %c0_6 = arith.constant 0 : index
    %c0_7 = arith.constant 0 : index
    %13 = vector.load %arg8[%c0_6, %c0_7] : memref<1x128xf32, #tpu.memory_space<vmem>>, vector<1x128xf32>
    %14 = vector.broadcast %13 : vector<1x128xf32> to vector<32x128xf32>
    %15 = arith.addf %12, %14 : vector<32x128xf32>
    %cst_8 = arith.constant 0.000000e+00 : f32
    %16 = vector.broadcast %cst_8 : f32 to vector<32x128xf32>
    %17 = arith.maximumf %15, %16 : vector<32x128xf32>
    %c64_i32 = arith.constant 64 : i32
    %18 = tpu.dynamic_rotate %17 by %c64_i32 dim 1 : vector<32x128xf32>, i32 -> vector<32x128xf32>
    %19 = arith.maximumf %17, %18 : vector<32x128xf32>
    %c32_i32 = arith.constant 32 : i32
    %20 = tpu.dynamic_rotate %19 by %c32_i32 dim 1 : vector<32x128xf32>, i32 -> vector<32x128xf32>
    %21 = arith.maximumf %19, %20 : vector<32x128xf32>
    %c16_i32 = arith.constant 16 : i32
    %22 = tpu.dynamic_rotate %21 by %c16_i32 dim 1 : vector<32x128xf32>, i32 -> vector<32x128xf32>
    %23 = arith.maximumf %21, %22 : vector<32x128xf32>
    %24 = arith.truncf %17 : vector<32x128xf32> to vector<32x128xbf16>
    %25 = arith.truncf %23 : vector<32x128xf32> to vector<32x128xbf16>
    %c0_9 = arith.constant 0 : index
    %c0_10 = arith.constant 0 : index
    %26 = vector.load %arg4[%c0_9, %c0_10] : memref<128x512xbf16, #tpu.memory_space<vmem>>, vector<128x512xbf16>
    %cst_11 = arith.constant dense<0.000000e+00> : vector<32x512xf32>
    %27 = tpu.matmul %24, %26, %cst_11 {dimension_numbers = #tpu.dot_dimension_numbers<[1], [0], [0], [1], [0, 0, 1, 1], [], []>} : vector<32x128xbf16>, vector<128x512xbf16>, vector<32x512xf32> -> vector<32x512xf32>
    %c0_12 = arith.constant 0 : index
    %c0_13 = arith.constant 0 : index
    %28 = vector.load %arg5[%c0_12, %c0_13] : memref<128x512xbf16, #tpu.memory_space<vmem>>, vector<128x512xbf16>
    %cst_14 = arith.constant dense<0.000000e+00> : vector<32x512xf32>
    %29 = tpu.matmul %25, %28, %cst_14 {dimension_numbers = #tpu.dot_dimension_numbers<[1], [0], [0], [1], [0, 0, 1, 1], [], []>} : vector<32x128xbf16>, vector<128x512xbf16>, vector<32x512xf32> -> vector<32x512xf32>
    %30 = arith.addf %27, %29 : vector<32x512xf32>
    %31 = tpu.iota {dimensions = array<i32: 1>} : vector<1x512xi32>
    %c64_i32_15 = arith.constant 64 : i32
    %32 = vector.broadcast %c64_i32_15 : i32 to vector<32x1xi32>
    %33 = arith.muli %1, %32 : vector<32x1xi32>
    %34 = vector.broadcast %31 : vector<1x512xi32> to vector<32x512xi32>
    %35 = vector.broadcast %33 : vector<32x1xi32> to vector<32x512xi32>
    %36 = arith.cmpi slt, %34, %35 : vector<32x512xi32>
    %cst_16 = arith.constant 0.000000e+00 : f32
    %37 = vector.broadcast %cst_16 : f32 to vector<32x512xf32>
    %38 = arith.select %36, %30, %37 : vector<32x512xi1>, vector<32x512xf32>
    %c0_17 = arith.constant 0 : index
    %c0_18 = arith.constant 0 : index
    %39 = vector.load %arg9[%c0_17, %c0_18] : memref<1x512xf32, #tpu.memory_space<vmem>>, vector<1x512xf32>
    %40 = vector.broadcast %39 : vector<1x512xf32> to vector<32x512xf32>
    %41 = arith.addf %38, %40 : vector<32x512xf32>
    %cst_19 = arith.constant 0.000000e+00 : f32
    %42 = vector.broadcast %cst_19 : f32 to vector<32x512xf32>
    %43 = arith.maximumf %41, %42 : vector<32x512xf32>
    %44 = arith.truncf %43 : vector<32x512xf32> to vector<32x512xbf16>
    %45 = vector.extract_strided_slice %43 {offsets = [0, 0], sizes = [32, 256], strides = [1, 1]} : vector<32x512xf32> to vector<32x256xf32>
    %46 = vector.extract_strided_slice %43 {offsets = [0, 256], sizes = [32, 256], strides = [1, 1]} : vector<32x512xf32> to vector<32x256xf32>
    %47 = arith.maximumf %45, %46 : vector<32x256xf32>
    %48 = vector.extract_strided_slice %47 {offsets = [0, 0], sizes = [32, 128], strides = [1, 1]} : vector<32x256xf32> to vector<32x128xf32>
    %49 = vector.extract_strided_slice %47 {offsets = [0, 128], sizes = [32, 128], strides = [1, 1]} : vector<32x256xf32> to vector<32x128xf32>
    %50 = arith.maximumf %48, %49 : vector<32x128xf32>
    %c64_i32_20 = arith.constant 64 : i32
    %51 = tpu.dynamic_rotate %50 by %c64_i32_20 dim 1 : vector<32x128xf32>, i32 -> vector<32x128xf32>
    %52 = arith.maximumf %50, %51 : vector<32x128xf32>
    %53 = arith.truncf %52 : vector<32x128xf32> to vector<32x128xbf16>
    %c0_21 = arith.constant 0 : index
    %c0_22 = arith.constant 0 : index
    %54 = vector.load %arg6[%c0_21, %c0_22] : memref<512x1024xbf16, #tpu.memory_space<vmem>>, vector<512x1024xbf16>
    %cst_23 = arith.constant dense<0.000000e+00> : vector<32x1024xf32>
    %55 = tpu.matmul %44, %54, %cst_23 {dimension_numbers = #tpu.dot_dimension_numbers<[1], [0], [0], [1], [0, 0, 1, 1], [], []>} : vector<32x512xbf16>, vector<512x1024xbf16>, vector<32x1024xf32> -> vector<32x1024xf32>
    %56 = tpu.iota {dimensions = array<i32: 1>} : vector<1x1024xi32>
    %c128_i32 = arith.constant 128 : i32
    %57 = vector.broadcast %c128_i32 : i32 to vector<32x1xi32>
    %58 = arith.muli %1, %57 : vector<32x1xi32>
    %59 = vector.broadcast %56 : vector<1x1024xi32> to vector<32x1024xi32>
    %60 = vector.broadcast %58 : vector<32x1xi32> to vector<32x1024xi32>
    %61 = arith.cmpi slt, %59, %60 : vector<32x1024xi32>
    %cst_24 = arith.constant 0xFF800000 : f32
    %62 = vector.broadcast %cst_24 : f32 to vector<32x1024xf32>
    %63 = arith.select %61, %55, %62 : vector<32x1024xi1>, vector<32x1024xf32>
    %64 = vector.extract_strided_slice %63 {offsets = [0, 0], sizes = [32, 512], strides = [1, 1]} : vector<32x1024xf32> to vector<32x512xf32>
    %65 = vector.extract_strided_slice %63 {offsets = [0, 512], sizes = [32, 512], strides = [1, 1]} : vector<32x1024xf32> to vector<32x512xf32>
    %66 = arith.maximumf %64, %65 : vector<32x512xf32>
    %67 = vector.extract_strided_slice %66 {offsets = [0, 0], sizes = [32, 256], strides = [1, 1]} : vector<32x512xf32> to vector<32x256xf32>
    %68 = vector.extract_strided_slice %66 {offsets = [0, 256], sizes = [32, 256], strides = [1, 1]} : vector<32x512xf32> to vector<32x256xf32>
    %69 = arith.maximumf %67, %68 : vector<32x256xf32>
    %70 = vector.extract_strided_slice %69 {offsets = [0, 0], sizes = [32, 128], strides = [1, 1]} : vector<32x256xf32> to vector<32x128xf32>
    %71 = vector.extract_strided_slice %69 {offsets = [0, 128], sizes = [32, 128], strides = [1, 1]} : vector<32x256xf32> to vector<32x128xf32>
    %72 = arith.maximumf %70, %71 : vector<32x128xf32>
    %c0_25 = arith.constant 0 : index
    %c0_26 = arith.constant 0 : index
    %73 = vector.load %arg7[%c0_25, %c0_26] : memref<128x128xbf16, #tpu.memory_space<vmem>>, vector<128x128xbf16>
    %cst_27 = arith.constant dense<0.000000e+00> : vector<32x128xf32>
    %74 = tpu.matmul %53, %73, %cst_27 {dimension_numbers = #tpu.dot_dimension_numbers<[1], [0], [0], [1], [0, 0, 1, 1], [], []>} : vector<32x128xbf16>, vector<128x128xbf16>, vector<32x128xf32> -> vector<32x128xf32>
    %75 = arith.addf %72, %74 : vector<32x128xf32>
    %c0_28 = arith.constant 0 : index
    %c0_29 = arith.constant 0 : index
    %76 = vector.load %arg10[%c0_28, %c0_29] : memref<1x128xf32, #tpu.memory_space<vmem>>, vector<1x128xf32>
    %77 = vector.broadcast %76 : vector<1x128xf32> to vector<32x128xf32>
    %78 = arith.addf %75, %77 : vector<32x128xf32>
    %cst_30 = arith.constant 0.000000e+00 : f32
    %79 = vector.broadcast %cst_30 : f32 to vector<32x128xf32>
    %80 = arith.maximumf %78, %79 : vector<32x128xf32>
    %c0_31 = arith.constant 0 : index
    %c0_32 = arith.constant 0 : index
    %81 = vector.load %arg11[%c0_31, %c0_32] : memref<32x128xf32, #tpu.memory_space<vmem>>, vector<32x128xf32>
    tpu.vector_store %arg11[%c0_31, %c0_32], %80 {strides = array<i32>} : memref<32x128xf32, #tpu.memory_space<vmem>>, vector<32x128xf32>,
    return
  }
  func.func @transform_0(%arg0: i32) -> (i32, i32) {
    %c0_i32 = arith.constant 0 : i32
    %c0_i32_0 = arith.constant 0 : i32
    return %arg0, %c0_i32 : i32, i32
  }
  func.func @transform_1(%arg0: i32) -> (i32, i32) {
    %c0_i32 = arith.constant 0 : i32
    %c0_i32_0 = arith.constant 0 : i32
    return %arg0, %c0_i32 : i32, i32
  }
  func.func @transform_2(%arg0: i32) -> (i32, i32) {
    %c0_i32 = arith.constant 0 : i32
    %c0_i32_0 = arith.constant 0 : i32
    %c0_i32_1 = arith.constant 0 : i32
    return %c0_i32, %c0_i32_0 : i32, i32
  }
  func.func @transform_3(%arg0: i32) -> (i32, i32) {
    %c0_i32 = arith.constant 0 : i32
    %c0_i32_0 = arith.constant 0 : i32
    %c0_i32_1 = arith.constant 0 : i32
    return %c0_i32, %c0_i32_0 : i32, i32
  }
  func.func @transform_4(%arg0: i32) -> (i32, i32) {
    %c0_i32 = arith.constant 0 : i32
    %c0_i32_0 = arith.constant 0 : i32
    %c0_i32_1 = arith.constant 0 : i32
    return %c0_i32, %c0_i32_0 : i32, i32
  }
  func.func @transform_5(%arg0: i32) -> (i32, i32) {
    %c0_i32 = arith.constant 0 : i32
    %c0_i32_0 = arith.constant 0 : i32
    %c0_i32_1 = arith.constant 0 : i32
    return %c0_i32, %c0_i32_0 : i32, i32
  }
  func.func @transform_6(%arg0: i32) -> (i32, i32) {
    %c0_i32 = arith.constant 0 : i32
    %c0_i32_0 = arith.constant 0 : i32
    %c0_i32_1 = arith.constant 0 : i32
    return %c0_i32, %c0_i32_0 : i32, i32
  }
  func.func @transform_7(%arg0: i32) -> (i32, i32) {
    %c0_i32 = arith.constant 0 : i32
    %c0_i32_0 = arith.constant 0 : i32
    %c0_i32_1 = arith.constant 0 : i32
    return %c0_i32, %c0_i32_0 : i32, i32
  }
  func.func @transform_8(%arg0: i32) -> (i32, i32) {
    %c0_i32 = arith.constant 0 : i32
    %c0_i32_0 = arith.constant 0 : i32
    %c0_i32_1 = arith.constant 0 : i32
    return %c0_i32, %c0_i32_0 : i32, i32
  }
  func.func @transform_9(%arg0: i32) -> (i32, i32) {
    %c0_i32 = arith.constant 0 : i32
    %c0_i32_0 = arith.constant 0 : i32
    %c0_i32_1 = arith.constant 0 : i32
    return %c0_i32, %c0_i32_0 : i32, i32
  }
  func.func @transform_10(%arg0: i32) -> (i32, i32) {
    %c0_i32 = arith.constant 0 : i32
    %c0_i32_0 = arith.constant 0 : i32
    return %arg0, %c0_i32 : i32, i32
  }
}

</mosaic_0001>

<bundles_post_ra>
// kernel: tpu_custom_call.1
= control target key start
LH: loop header
LB: loop body
LE: loop exit
PB: predicated region body
PF: predicated region fallthrough
CT: control target
= control target key end

     0   :  { %15 = vsyncpa [#allocation3], 0  ;;  %s4675_s0 = inlined_call_operand.hbm [shape: bf16[32,32], index: 0, kind: input, shape index: {}]   ;;  %s4676_s1 = inlined_call_operand.vmem [shape: s32[32,1], index: 1, kind: input, shape index: {}]   ;;  %s4677_s2 = inlined_call_operand.vmem [shape: bf16[32,256], index: 2, kind: input, shape index: {}]   ;;  %s4678_s3 = inlined_call_operand.hbm [shape: bf16[128,512], index: 3, kind: input, shape index: {}]   ;;  %s4679_s4 = inlined_call_operand.hbm [shape: bf16[128,512], index: 4, kind: input, shape index: {}]   ;;  %s4680_s5 = inlined_call_operand.hbm [shape: bf16[512,1024], index: 5, kind: input, shape index: {}]   ;;  %s4681_s6 = inlined_call_operand.hbm [shape: bf16[128,128], index: 6, kind: input, shape index: {}]   ;;  %s4682_s7 = inlined_call_operand.vmem [shape: f32[1,128], index: 7, kind: input, shape index: {}]   ;;  %s4683_s8 = inlined_call_operand.vmem [shape: f32[1,512], index: 8, kind: input, shape index: {}]   ;;  %s4684_s9 = inlined_call_operand.vmem [shape: f32[1,128], index: 9, kind: input, shape index: {}]   ;;  %s4685_s10 = inlined_call_operand.hbm [shape: f32[32,128], index: 10, kind: output, shape index: {}]  }
   0x1   :  { %16 = vsyncpa [#allocation6], 0 }
   0x2   :  { %17 = vsyncpa [#allocation9], 0 }
   0x3   :  { %18 = vsyncpa [#allocation4], 0  ;;  %s4003_s13 = smov [#allocation5]   ;;  %s3863_s17 = scalar_lea.hbm %s4678_s3, 4096 }
   0x4   :  { %s40_s14 = sshll.u32 %s4003_s13, 4  ;;  %p3864_p0 = scmp.ne.s32.totalorder %s4678_s3, %s3863_s17  ;;  %s41_s14 = int_to_ptr.vmem [resolvable:$true] %s40_s14 }
   0x5   :  { %p3867_p1 = scmp.lt.u32.totalorder %s3863_s17, %s4678_s3 }
   0x7   :  { %p3869_p2 = pnand %p3867_p1, %p3864_p0 }
   0x9   :  { %3872 = shalt.err (!%p3869_p2)
}
   0xa   :  { %s3873_s22 = scalar_lea.vmem %s41_s14, 4096  ;;  %p3878_p4 = scmp.lt.s32.totalorder %s41_s14, %s41_s14 }
   0xb   :  { %p3874_p3 = scmp.ne.s32.totalorder %s41_s14, %s3873_s22  ;;  %p3879_p5 = scmp.lt.s32.totalorder %s3873_s22, %s3873_s22 }
   0xd   :  { %p3880_p6 = por %p3879_p5, %p3878_p4 }
   0xf   :  { %p3881_p7 = pnand %p3880_p6, %p3874_p3 }
  0x11   :  { %3884 = shalt.err (!%p3881_p7)
}
  0x12   :  { %s4004_s23 = smov 256   ;;  %s4005_s24 = smov 16  }
  0x13   :  { %46 = dma.hbm_to_vmem [thread:$0]  %s4678_s3, 4096, %s41_s14, [#allocation6], %s4004_s23, %s4004_s23, %s4005_s24  }
  0x14   :  { %s4006_s27 = smov [#allocation8]   ;;  %s3885_s11 = scalar_lea.hbm %s4680_s5, 32768 }
  0x15   :  { %s64_s28 = sshll.u32 %s4006_s27, 4  ;;  %p3886_p8 = scmp.ne.s32.totalorder %s4680_s5, %s3885_s11  ;;  %s65_s28 = int_to_ptr.vmem [resolvable:$true] %s64_s28 }
  0x16   :  { %p3889_p9 = scmp.lt.u32.totalorder %s3885_s11, %s4680_s5 }
  0x18   :  { %p3891_p10 = pnand %p3889_p9, %p3886_p8 }
  0x1a   :  { %3894 = shalt.err (!%p3891_p10)
}
  0x1b   :  { %s3895_s17 = scalar_lea.vmem %s65_s28, 32768  ;;  %p3900_p12 = scmp.lt.s32.totalorder %s65_s28, %s65_s28 }
  0x1c   :  { %p3896_p11 = scmp.ne.s32.totalorder %s65_s28, %s3895_s17  ;;  %p3901_p13 = scmp.lt.s32.totalorder %s3895_s17, %s3895_s17 }
  0x1e   :  { %p3902_p0 = por %p3901_p13, %p3900_p12 }
  0x20   :  { %p3903_p1 = pnand %p3902_p0, %p3896_p11 }
  0x22   :  { %3906 = shalt.err (!%p3903_p1)
}
  0x23   :  { %s4007_s3 = smov 512   ;;  %s4008_s14 = smov 32  }
  0x24   :  { %70 = dma.hbm_to_vmem [thread:$0]  %s4680_s5, 32768, %s65_s28, [#allocation9], %s4007_s3, %s4007_s3, %s4008_s14  }
  0x25   :  { %s4009_s20 = smov [#allocation2]   ;;  %s3907_s26 = scalar_lea.hbm %s4675_s0, 256 }
  0x26   :  { %s24_s21 = sshll.u32 %s4009_s20, 4  ;;  %p3908_p2 = scmp.ne.s32.totalorder %s4675_s0, %s3907_s26  ;;  %s25_s21 = int_to_ptr.vmem [resolvable:$true] %s24_s21 }
  0x27   :  { %p3911_p3 = scmp.lt.u32.totalorder %s3907_s26, %s4675_s0 }
  0x29   :  { %p3913_p4 = pnand %p3911_p3, %p3908_p2 }
  0x2b   :  { %3916 = shalt.err (!%p3913_p4)
}
  0x2c   :  { %s3917_s12 = scalar_lea.vmem %s25_s21, 256  ;;  %p3922_p6 = scmp.lt.s32.totalorder %s25_s21, %s25_s21 }
  0x2d   :  { %p3918_p5 = scmp.ne.s32.totalorder %s25_s21, %s3917_s12  ;;  %p3923_p7 = scmp.lt.s32.totalorder %s3917_s12, %s3917_s12 }
  0x2f   :  { %p3924_p8 = por %p3923_p7, %p3922_p6 }
  0x31   :  { %p3925_p9 = pnand %p3924_p8, %p3918_p5 }
  0x33   :  { %3928 = shalt.err (!%p3925_p9)
}
  0x34   :  { %s4010_s5 = smov 64   ;;  %s4011_s28 = smov 4  }
  0x35   :  { %30 = dma.hbm_to_vmem [thread:$0]  %s4675_s0, 256, %s25_s21, [#allocation3], %s4010_s5, %s4010_s5, %s4011_s28  }
  0x36   :  { %s4012_s16 = smov [#allocation7]   ;;  %s4013_s3 = smov [#allocation10]  }
  0x37   :  { %s52_s17 = sshll.u32 %s4012_s16, 4  ;;  %s76_s18 = sshll.u32 %s4013_s3, 4  ;;  %s53_s17 = int_to_ptr.vmem [resolvable:$true] %s52_s17  ;;  %s77_s18 = int_to_ptr.vmem [resolvable:$true] %s76_s18 }
  0x38   :  { %s3929_s22 = scalar_lea.hbm %s4679_s4, 4096 }
  0x39   :  { %p3930_p10 = scmp.ne.s32.totalorder %s4679_s4, %s3929_s22  ;;  %p3933_p11 = scmp.lt.u32.totalorder %s3929_s22, %s4679_s4 }
  0x3b   :  { %p3935_p12 = pnand %p3933_p11, %p3930_p10 }
  0x3d   :  { %3938 = shalt.err (!%p3935_p12)
}
  0x3e   :  { %s3939_s0 = scalar_lea.vmem %s53_s17, 4096  ;;  %p3944_p0 = scmp.lt.s32.totalorder %s53_s17, %s53_s17 }
  0x3f   :  { %p3940_p13 = scmp.ne.s32.totalorder %s53_s17, %s3939_s0  ;;  %p3945_p1 = scmp.lt.s32.totalorder %s3939_s0, %s3939_s0 }
  0x41   :  { %p3946_p2 = por %p3945_p1, %p3944_p0 }
  0x43   :  { %p3947_p3 = pnand %p3946_p2, %p3940_p13 }
  0x45   :  { %3950 = shalt.err (!%p3947_p3)
}
  0x46   :  { %58 = dma.hbm_to_vmem [thread:$0]  %s4679_s4, 4096, %s53_s17, [#allocation6], %s4004_s23, %s4004_s23, %s4005_s24  }
  0x47   :  { %s3951_s13 = scalar_lea.hbm %s4681_s6, 1024 }
  0x48   :  { %p3952_p4 = scmp.ne.s32.totalorder %s4681_s6, %s3951_s13  ;;  %p3955_p5 = scmp.lt.u32.totalorder %s3951_s13, %s4681_s6 }
  0x4a   :  { %p3957_p6 = pnand %p3955_p5, %p3952_p4 }
  0x4c   :  { %3960 = shalt.err (!%p3957_p6)
}
  0x4d   :  { %s3961_s20 = scalar_lea.vmem %s77_s18, 1024  ;;  %p3966_p8 = scmp.lt.s32.totalorder %s77_s18, %s77_s18 }
  0x4e   :  { %p3962_p7 = scmp.ne.s32.totalorder %s77_s18, %s3961_s20  ;;  %p3967_p9 = scmp.lt.s32.totalorder %s3961_s20, %s3961_s20 }
  0x50   :  { %p3968_p10 = por %p3967_p9, %p3966_p8 }
  0x52   :  { %p3969_p11 = pnand %p3968_p10, %p3962_p7 }
  0x54   :  { %3972 = shalt.err (!%p3969_p11)
}
  0x55   :  { %82 = dma.hbm_to_vmem [thread:$0]  %s4681_s6, 1024, %s77_s18, [#allocation9], %s4010_s5, %s4010_s5, %s4011_s28  }
  0x56   :  { %3995 = dma.done.wait [#allocation3], 256  }
  0x57   :  { %3996 = vsyncadd [#allocation3], 4294967040 }
  0x58   :  { %3997 = dma.done.wait [#allocation6], 8192  }
  0x59   :  { %3998 = vsyncadd [#allocation6], 4294959104 }
  0x5a   :  { %3999 = dma.done.wait [#allocation9], 33792  }
  0x5b   :  { %4000 = vsyncadd [#allocation9], 4294933504  ;;  %v4014_v0 = vmov 0   ;;  %v3739_v1 = vld [vmem:[%s4677_s2 + $0x4] ss:$8 sps:$4 sm:$0xff]   ;;  %v4176_v9 = vld [vmem:[%s4676_s1 + $0x10] sm:$0xff] }
  0x5c   :  { %198 = vmatprep.mubr.bf16.mxu0 %v4014_v0  ;;  %3697 = vset.pattern.permute.xlu0 %v4014_v0  ;;  %v3741_v2 = vld [vmem:[%s4677_s2] ss:$8 sps:$4 sm:$0xff]   ;;  %v3742_v3 = vld [vmem:[%s4677_s2 + $0x14] ss:$8 sps:$4 sm:$0xff]   ;;  %v3744_v4 = vld [vmem:[%s4677_s2 + $0x10] ss:$8 sps:$4 sm:$0xff]   ;;  %v115_v12 = vcvt.s32.f32 %v4176_v9 }
  0x5d   :  { %3698 = vset.pattern.permute.xlu1 %v4014_v0  ;;  %558 = vmatprep.mubr.bf16.mxu1 %v4014_v0  ;;  %v3745_v5 = vld [vmem:[#allocation2] sm:$0xff]   ;;  %v4171_v8 = vld [vmem:[%s4676_s1 + $0x8] sm:$0xff]  ;;  %v4181_v10 = vld [vmem:[%s4676_s1 + $0x18] sm:$0xff]  ;;  %vm159_vm0 = vcmask 261120   ;;  %s4015_s22 = smov [#allocation11]  }
  0x5e   :  { %166 = vmatprep.subr.bf16.mxu0 %v3739_v1  ;;  %v4165_v6 = vld [vmem:[%s4676_s1] sm:$0xff]  ;;  %v114_v11 = vcvt.s32.f32 %v4171_v8  ;;  %v116_v13 = vcvt.s32.f32 %v4181_v10  ;;  %v119_v16 = vmax.f32 %v115_v12, 1.0  ;;  %v3746_v18 = vld [vmem:[#allocation2 + $0x8] sm:$0xff]   ;;  %s3252_s6 = sshll.u32 %s4015_s22, 4  ;;  %s3253_s6 = int_to_ptr.vmem [resolvable:$true] %s3252_s6 }
  0x5f   :  { %167 = vmatpush1.bf16.msra.mxu0 %v3741_v2  ;;  %v113_v7 = vcvt.s32.f32 %v4165_v6  ;;  %v3274_v30 = vld [vmem:[%s4682_s7] ss:$0 sm:$0xff]  ;;  %v3757_v12 = vld [vmem:[#allocation7 + $0x2c] ss:$16 sps:$4 sm:$0xff]   ;;  %p3978_p13 = scmp.lt.s32.totalorder %s3253_s6, %s3253_s6 }
  0x60   :  { %168 = vmatprep.subr.bf16.mxu0 %v3742_v3  ;;  %v118_v15 = vmax.f32 %v114_v11, 1.0  ;;  %v120_v17 = vmax.f32 %v116_v13, 1.0  ;;  %v3747_v3 = vld [vmem:[#allocation7 + $0x4] ss:$16 sps:$4 sm:$0xff]   ;;  %v3755_v13 = vld [vmem:[#allocation7 + $0x28] ss:$16 sps:$4 sm:$0xff]  }
  0x61   :  { %v117_v14 = vmax.f32 %v113_v7, 1.0  ;;  %v3752_v7 = vld [vmem:[#allocation7] ss:$16 sps:$4 sm:$0xff]   ;;  %v3753_v11 = vld [vmem:[#allocation7 + $0x24] ss:$16 sps:$4 sm:$0xff]   ;;  %526 = vmatprep.subr.bf16.mxu1 %v3747_v3 }
  0x62   :  { %527 = vmatpush1.bf16.msra.mxu1 %v3752_v7 }
  0x63   :  { %169 = vmatpush1.bf16.msra.mxu0 %v3744_v4  ;;  %3851 = vrcp.f32 %v117_v14  ;;  %v3749_v4 = vld [vmem:[#allocation7 + $0x8] ss:$16 sps:$4 sm:$0xff]   ;;  %v3758_v14 = vld [vmem:[#allocation7 + $0x20] ss:$16 sps:$4 sm:$0xff]   ;;  %528 = vmatprep.subr.bf16.mxu1 %v3753_v11 }
  0x64   :  { %3853 = vrcp.f32 %v118_v15  ;;  %v3759_v15 = vld [vmem:[#allocation7 + $0x44] ss:$16 sps:$4 sm:$0xff]   ;;  %v3804_v11 = vld [vmem:[#allocation5 + $0x28] ss:$16 sps:$4 sm:$0xff]  }
  0x65   :  { %3855 = vrcp.f32 %v119_v16  ;;  %v3763_v16 = vld [vmem:[#allocation7 + $0x4c] ss:$16 sps:$4 sm:$0xff]  }
  0x66   :  { %3272 = vmatmul.mubr.msk.bf16.vlgmr.msra.gmra.mrb[0].mxu0 %vm159_vm0, %v3745_v5  ;;  %3857 = vrcp.f32 %v120_v17  ;;  %v3751_v5 = vld [vmem:[#allocation7 + $0xc] ss:$16 sps:$4 sm:$0xff]   ;;  %529 = vmatpush1.bf16.msra.mxu1 %v3758_v14  ;;  %v3761_v17 = vld [vmem:[#allocation7 + $0x48] ss:$16 sps:$4 sm:$0xff]  }
  0x67   :  { %208 = vmatprep.mubr.bf16.mxu0 %v4014_v0  ;;  %579 = vmatprep.subr.bf16.mxu0 %v3751_v5  ;;  %v3803_v5 = vld [vmem:[#allocation5 + $0x24] ss:$16 sps:$4 sm:$0xff]   ;;  %v3812_v14 = vld [vmem:[#allocation5 + $0x4c] ss:$16 sps:$4 sm:$0xff]  }
  0x68   :  { %580 = vmatpush1.bf16.msra.mxu0 %v3749_v4  ;;  %530 = vmatprep.subr.bf16.mxu1 %v3759_v15  ;;  %v3798_v4 = vld [vmem:[#allocation5 + $0x8] ss:$16 sps:$4 sm:$0xff]  }
  0x69   :  { %581 = vmatprep.subr.bf16.mxu0 %v3757_v12 }
  0x6c   :  { %582 = vmatpush1.bf16.msra.mxu0 %v3755_v13  ;;  %v3809_v13 = vld [vmem:[#allocation5 + $0x44] ss:$16 sps:$4 sm:$0xff]  }
  0x6d   :  { %v3852_v19 = vpop.eup %3851  ;;  %583 = vmatprep.subr.bf16.mxu0 %v3763_v16 }
  0x6e   :  { %3273 = vmatmul.mubr.msk.bf16.gmra.mrb[4].mxu0 %vm159_vm0, %v3746_v18  ;;  %v3854_v20 = vpop.eup %3853  ;;  %221 = vperm.xlu0 %3697, %v3852_v19   ;;  %v3764_v18 = vld [vmem:[#allocation7 + $0x40] ss:$16 sps:$4 sm:$0xff]   ;;  %v3765_v19 = vld [vmem:[#allocation7 + $0x64] ss:$16 sps:$4 sm:$0xff]  }
  0x6f   :  { %611 = vmatprep.mubr.bf16.mxu0 %v4014_v0  ;;  %v3856_v21 = vpop.eup %3855  ;;  %531 = vmatpush1.bf16.msra.mxu1 %v3764_v18  ;;  %v3810_v18 = vld [vmem:[#allocation5 + $0x48] ss:$16 sps:$4 sm:$0xff]  }
  0x70   :  { %231 = vperm.xlu1 %3698, %v3856_v21   ;;  %v3858_v22 = vpop.eup %3857  ;;  %584 = vmatpush1.bf16.msra.mxu0 %v3761_v17  ;;  %v3767_v21 = vld [vmem:[#allocation7 + $0x68] ss:$16 sps:$4 sm:$0xff]   ;;  %v3807_v17 = vld [vmem:[#allocation5 + $0x40] ss:$16 sps:$4 sm:$0xff]  }
  0x71   :  { %532 = vmatprep.subr.bf16.mxu1 %v3765_v19 }
  0x72   :  { %226 = vperm.xlu0 %3697, %v3854_v20   ;;  %v3769_v20 = vld [vmem:[#allocation7 + $0x6c] ss:$16 sps:$4 sm:$0xff]  }
  0x73   :  { %585 = vmatprep.subr.bf16.mxu0 %v3769_v20  ;;  %v3815_v20 = vld [vmem:[#allocation5 + $0x64] ss:$16 sps:$4 sm:$0xff]  }
  0x74   :  { %236 = vperm.xlu1 %3698, %v3858_v22   ;;  %v3770_v22 = vld [vmem:[#allocation7 + $0x60] ss:$16 sps:$4 sm:$0xff]   ;;  %586 = vmatpush1.bf16.msra.mxu0 %v3767_v21  ;;  %v3818_v21 = vld [vmem:[#allocation5 + $0x6c] ss:$16 sps:$4 sm:$0xff]  }
  0x75   :  { %533 = vmatpush1.bf16.msra.mxu1 %v3770_v22  ;;  %v3813_v22 = vld [vmem:[#allocation5 + $0x60] ss:$16 sps:$4 sm:$0xff]  }
  0xed   :  { %v222_v23 = vpop.permute.xlu0 %221 }
  0xef   :  { %v232_v28 = vpop.permute.xlu1 %231 }
  0xf1   :  { %v227_v29 = vpop.permute.xlu0 %226 }
  0xf3   :  { %v237_v39 = vpop.permute.xlu1 %236 }
 0x139   :  { %v200_v24 = vpop.f32.mrb[0].mxu0 }
 0x13a   :  { %v202_v25 = vpop.f32.mrb[1].mxu0 }
 0x13b   :  { %v239_v26 = vmul.f32 %v222_v23, %v202_v25  ;;  %v204_v27 = vpop.f32.mrb[2].mxu0  ;;  %v3771_v23 = vld [vmem:[#allocation7 + $0x84] ss:$16 sps:$4 sm:$0xff]   ;;  %v3773_v25 = vld [vmem:[#allocation7 + $0x88] ss:$16 sps:$4 sm:$0xff]  }
 0x13c   :  { %v206_v31 = vpop.f32.mrb[3].mxu0  ;;  %534 = vmatprep.subr.bf16.mxu1 %v3771_v23  ;;  %v3816_v23 = vld [vmem:[#allocation5 + $0x68] ss:$16 sps:$4 sm:$0xff]  }
 0x13d   :  { %v243_v32 = vadd.f32 %v239_v26, %v200_v24  ;;  %v240_v33 = vmul.f32 %v227_v29, %v206_v31  ;;  %v3775_v24 = vld [vmem:[#allocation7 + $0x8c] ss:$16 sps:$4 sm:$0xff]   ;;  %v3776_v26 = vld [vmem:[#allocation7 + $0x80] ss:$16 sps:$4 sm:$0xff]   ;;  %v3779_v29 = vld [vmem:[#allocation7 + $0xa8] ss:$16 sps:$4 sm:$0xff]  }
 0x13e   :  { %587 = vmatprep.subr.bf16.mxu0 %v3775_v24  ;;  %535 = vmatpush1.bf16.msra.mxu1 %v3776_v26  ;;  %v3783_v31 = vld [vmem:[#allocation7 + $0xc4] ss:$16 sps:$4 sm:$0xff]   ;;  %v3819_v26 = vld [vmem:[#allocation5 + $0x80] ss:$16 sps:$4 sm:$0xff]  }
 0x13f   :  { %v254_v34 = vadd.f32 %v3274_v30, %v243_v32  ;;  %v244_v35 = vadd.f32 %v240_v33, %v204_v27  ;;  %v3777_v27 = vld [vmem:[#allocation7 + $0xa4] ss:$16 sps:$4 sm:$0xff]   ;;  %588 = vmatpush1.bf16.msra.mxu0 %v3773_v25  ;;  %v3787_v32 = vld [vmem:[#allocation7 + $0xcc] ss:$16 sps:$4 sm:$0xff]   ;;  %v3785_v33 = vld [vmem:[#allocation7 + $0xc8] ss:$16 sps:$4 sm:$0xff]  }
 0x140   :  { %536 = vmatprep.subr.bf16.mxu1 %v3777_v27  ;;  %v3821_v24 = vld [vmem:[#allocation5 + $0x84] ss:$16 sps:$4 sm:$0xff]   ;;  %v3824_v25 = vld [vmem:[#allocation5 + $0x8c] ss:$16 sps:$4 sm:$0xff]   ;;  %v3822_v27 = vld [vmem:[#allocation5 + $0x88] ss:$16 sps:$4 sm:$0xff]  }
 0x141   :  { %v255_v36 = vadd.f32 %v3274_v30, %v244_v35  ;;  %v210_v37 = vpop.f32.mrb[4].mxu0  ;;  %v4191_v40 = vmax.f32 %v254_v34, 0.0  ;;  %v3788_v34 = vld [vmem:[#allocation7 + $0xc0] ss:$16 sps:$4 sm:$0xff]   ;;  %v3789_v35 = vld [vmem:[#allocation7 + $0xe4] ss:$16 sps:$4 sm:$0xff]  }
 0x142   :  { %v212_v38 = vpop.f32.mrb[5].mxu0 }
 0x143   :  { %v4193_v41 = vmax.f32 %v255_v36, 0.0  ;;  %v241_v42 = vmul.f32 %v232_v28, %v212_v38  ;;  %v214_v43 = vpop.f32.mrb[6].mxu0  ;;  %v3781_v28 = vld [vmem:[#allocation7 + $0xac] ss:$16 sps:$4 sm:$0xff]   ;;  %v3794_v38 = vld [vmem:[#allocation7 + $0xe0] ss:$16 sps:$4 sm:$0xff]  }
 0x144   :  { %v216_v44 = vpop.f32.mrb[7].mxu0  ;;  %589 = vmatprep.subr.bf16.mxu0 %v3781_v28  ;;  %v3793_v36 = vld [vmem:[#allocation7 + $0xec] ss:$16 sps:$4 sm:$0xff]   ;;  %v3827_v28 = vld [vmem:[#allocation5 + $0xa4] ss:$16 sps:$4 sm:$0xff]  }
 0x145   :  { %v245_v45 = vadd.f32 %v241_v42, %v210_v37  ;;  %v242_v46 = vmul.f32 %v237_v39, %v216_v44  ;;  %v3699_v47 = vpack.i.bf16 %v4193_v41, %v4191_v40  ;;  %590 = vmatpush1.bf16.msra.mxu0 %v3779_v29  ;;  %v3791_v37 = vld [vmem:[#allocation7 + $0xe8] ss:$16 sps:$4 sm:$0xff]   ;;  %v3797_v39 = vld [vmem:[#allocation5 + $0x4] ss:$16 sps:$4 sm:$0xff]   ;;  %v3800_v42 = vld [vmem:[#allocation5 + $0xc] ss:$16 sps:$4 sm:$0xff]  }
 0x146   :  { %591 = vmatprep.subr.bf16.mxu0 %v3787_v32  ;;  %v3830_v29 = vld [vmem:[#allocation5 + $0xac] ss:$16 sps:$4 sm:$0xff]   ;;  %v3833_v32 = vld [vmem:[#allocation5 + $0xc4] ss:$16 sps:$4 sm:$0xff]  }
 0x147   :  { %v256_v48 = vadd.f32 %v3274_v30, %v245_v45  ;;  %v246_v49 = vadd.f32 %v242_v46, %v214_v43  ;;  %3700 = vrot.lane.b32.xlu0 %v3699_v47, %s4010_s5 }
 0x149   :  { %v4198_v50 = vmax.f32 %v256_v48, 0.0  ;;  %v257_v51 = vadd.f32 %v3274_v30, %v246_v49  ;;  %v3782_v30 = vld [vmem:[#allocation7 + $0xa0] ss:$16 sps:$4 sm:$0xff]   ;;  %592 = vmatpush1.bf16.msra.mxu0 %v3785_v33  ;;  %v903_v49 = vmul.u32 64, %v4165_v6  ;;  %v3836_v33 = vld [vmem:[#allocation5 + $0xcc] ss:$16 sps:$4 sm:$0xff]  }
 0x14a   :  { %537 = vmatpush1.bf16.msra.mxu1 %v3782_v30  ;;  %593 = vmatprep.subr.bf16.mxu0 %v3793_v36  ;;  %v3825_v30 = vld [vmem:[#allocation5 + $0xa0] ss:$16 sps:$4 sm:$0xff]   ;;  %v3839_v36 = vld [vmem:[#allocation5 + $0xe4] ss:$16 sps:$4 sm:$0xff]  }
 0x14b   :  { %v4200_v52 = vmax.f32 %v257_v51, 0.0  ;;  %538 = vmatprep.subr.bf16.mxu1 %v3783_v31  ;;  %v3828_v31 = vld [vmem:[#allocation5 + $0xa8] ss:$16 sps:$4 sm:$0xff]  }
 0x14d   :  { %v3704_v53 = vpack.i.bf16 %v4200_v52, %v4198_v50  ;;  %594 = vmatpush1.bf16.msra.mxu0 %v3791_v37  ;;  %v3842_v37 = vld [vmem:[#allocation5 + $0xec] ss:$16 sps:$4 sm:$0xff]  }
 0x14e   :  { %539 = vmatpush1.bf16.msra.mxu1 %v3788_v34  ;;  %845 = vmatprep.subr.bf16.mxu0 %v3800_v42  ;;  %v3831_v34 = vld [vmem:[#allocation5 + $0xc0] ss:$16 sps:$4 sm:$0xff]   ;;  %v1040_v42 = vld [vmem:[#allocation8 + $0x8] sm:$0xff] }
 0x14f   :  { %3705 = vrot.lane.b32.xlu1 %v3704_v53, %s4010_s5  ;;  %540 = vmatprep.subr.bf16.mxu1 %v3789_v35  ;;  %v3834_v35 = vld [vmem:[#allocation5 + $0xc8] ss:$16 sps:$4 sm:$0xff]  }
 0x152   :  { %541 = vmatpush1.bf16.msra.mxu1 %v3794_v38  ;;  %v1039_v38 = vld [vmem:[#allocation8] sm:$0xff] }
 0x153   :  { %792 = vmatprep.subr.bf16.mxu1 %v3797_v39  ;;  %v1043_v39 = vld [vmem:[#allocation8 + $0x20] sm:$0xff] }
 0x1b9   :  { %v3701_v54 = vpop.permute.xlu0 %3700 }
 0x1ba   :  { %v3703_v55 = vunpack.i.h.bf16 %v3701_v54  ;;  %v3702_v56 = vunpack.i.l.bf16 %v3701_v54 }
 0x1bc   :  { %v4206_v57 = vmax.f32 %v4191_v40, %v3702_v56  ;;  %v4209_v58 = vmax.f32 %v4193_v41, %v3703_v55  ;;  %v905_v55 = vmul.u32 64, %v4176_v9  ;;  %v3795_v9 = vld [vmem:[#allocation5] ss:$16 sps:$4 sm:$0xff]  }
 0x1be   :  { %v3709_v59 = vpack.i.bf16 %v4209_v58, %v4206_v57 }
 0x1c0   :  { %3710 = vrot.lane.b32.xlu0 %v3709_v59, %s4008_s14 }
 0x1c1   :  { %v3706_v60 = vpop.permute.xlu1 %3705 }
 0x1c2   :  { %v3708_v61 = vunpack.i.h.bf16 %v3706_v60  ;;  %v3707_v62 = vunpack.i.l.bf16 %v3706_v60 }
 0x1c4   :  { %v4215_v63 = vmax.f32 %v4198_v50, %v3707_v62  ;;  %v4218_v1 = vmax.f32 %v4200_v52, %v3708_v61 }
 0x1c6   :  { %v3714_v2 = vpack.i.bf16 %v4218_v1, %v4215_v63 }
 0x1c8   :  { %3715 = vrot.lane.b32.xlu1 %v3714_v2, %s4008_s14 }
 0x232   :  { %v3711_v43 = vpop.permute.xlu0 %3710 }
 0x233   :  { %v3713_v44 = vunpack.i.h.bf16 %v3711_v43  ;;  %v3712_v45 = vunpack.i.l.bf16 %v3711_v43  ;;  %v1044_v43 = vld [vmem:[#allocation8 + $0x28] sm:$0xff] }
 0x235   :  { %v282_v46 = vmax.f32 %v4206_v57, %v3712_v45  ;;  %v283_v47 = vmax.f32 %v4209_v58, %v3713_v44  ;;  %v904_v57 = vmul.u32 64, %v4171_v8  ;;  %v906_v58 = vmul.u32 64, %v4181_v10  ;;  %v3801_v8 = vld [vmem:[#allocation5 + $0x20] ss:$16 sps:$4 sm:$0xff]   ;;  %v3840_v45 = vld [vmem:[#allocation5 + $0xe8] ss:$16 sps:$4 sm:$0xff]  }
 0x236   :  { %v3837_v44 = vld [vmem:[#allocation5 + $0xe0] ss:$16 sps:$4 sm:$0xff]  }
 0x237   :  { %v3719_v48 = vpack.i.bf16 %v283_v47, %v282_v46 }
 0x239   :  { %3720 = vrot.lane.b32.xlu0 %v3719_v48, %s4005_s24  ;;  %v1047_v48 = vld [vmem:[#allocation8 + $0x40] sm:$0xff] }
 0x23a   :  { %v3716_v51 = vpop.permute.xlu1 %3715 }
 0x23b   :  { %v3718_v53 = vunpack.i.h.bf16 %v3716_v51  ;;  %v3717_v54 = vunpack.i.l.bf16 %v3716_v51  ;;  %v1048_v51 = vld [vmem:[#allocation8 + $0x48] sm:$0xff] }
 0x23d   :  { %908 = vperm.xlu0 %3697, %v903_v49   ;;  %v284_v56 = vmax.f32 %v4215_v63, %v3717_v54  ;;  %v285_v59 = vmax.f32 %v4218_v1, %v3718_v53  ;;  %v3806_v1 = vld [vmem:[#allocation5 + $0x2c] ss:$16 sps:$4 sm:$0xff]   ;;  %v1051_v49 = vld [vmem:[#allocation8 + $0x60] sm:$0xff]  ;;  %v298_v54 = vpack.c.bf16 %v4193_v41, %v4191_v40 }
 0x23e   :  { %v1052_v53 = vld [vmem:[#allocation8 + $0x68] sm:$0xff] }
 0x23f   :  { %v3724_v60 = vpack.i.bf16 %v285_v59, %v284_v56  ;;  %v3349_v40 = vcombine.low %v1048_v51, %v1052_v53 }
 0x241   :  { %914 = vperm.xlu0 %3697, %v905_v55   ;;  %3725 = vrot.lane.b32.xlu1 %v3724_v60, %s4005_s24  ;;  %v3339_v55 = vcombine.low %v1039_v38, %v1043_v39  ;;  %v3350_v60 = vcombine.high %v1048_v51, %v1052_v53  ;;  %v1111_v51 = vld [vmem:[#allocation8 + $0x240] sm:$0xff] }
 0x242   :  { %v1115_v53 = vld [vmem:[#allocation8 + $0x260] sm:$0xff] }
 0x245   :  { %911 = vperm.xlu1 %3698, %v904_v57   ;;  %v1055_v57 = vld [vmem:[#allocation8 + $0x80] sm:$0xff] }
 0x249   :  { %917 = vperm.xlu1 %3698, %v906_v58   ;;  %v1059_v58 = vld [vmem:[#allocation8 + $0xa0] sm:$0xff] }
 0x24a   :  { %v3356_v41 = vcombine.high %v1055_v57, %v1059_v58 }
 0x2ab   :  { %v3721_v6 = vpop.permute.xlu0 %3720 }
 0x2ac   :  { %v3723_v61 = vunpack.i.h.bf16 %v3721_v6  ;;  %v3722_v62 = vunpack.i.l.bf16 %v3721_v6  ;;  %v1056_v6 = vld [vmem:[#allocation8 + $0x88] sm:$0xff] }
 0x2ae   :  { %v295_v2 = vmax.f32 %v283_v47, %v3723_v61  ;;  %v294_v3 = vmax.f32 %v282_v46, %v3722_v62  ;;  %v3340_v46 = vcombine.high %v1039_v38, %v1043_v39  ;;  %v3342_v47 = vcombine.high %v1040_v42, %v1044_v43  ;;  %v1060_v61 = vld [vmem:[#allocation8 + $0xa8] sm:$0xff] }
 0x2af   :  { %v3347_v62 = vcombine.low %v1047_v48, %v1051_v49 }
 0x2b0   :  { %v300_v63 = vpack.c.bf16 %v295_v2, %v294_v3  ;;  %v3358_v2 = vcombine.high %v1056_v6, %v1060_v61  ;;  %v1063_v3 = vld [vmem:[#allocation8 + $0xc0] sm:$0xff] }
 0x2b2   :  { %559 = vmatmul.mubr.bf16.vlgmr.msra.gmra.mrb[0].mxu1 %v300_v63  ;;  %612 = vmatmul.mubr.bf16.vlgmr.msra.gmra.mrb[8].mxu0 %v300_v63  ;;  %v1068_v63 = vld [vmem:[#allocation8 + $0xe8] sm:$0xff] }
 0x2b3   :  { %793 = vmatpush1.bf16.msra.mxu1 %v3795_v9  ;;  %846 = vmatpush1.bf16.msra.mxu0 %v3798_v4  ;;  %v3726_v7 = vpop.permute.xlu1 %3725  ;;  %v1067_v9 = vld [vmem:[#allocation8 + $0xe0] sm:$0xff]  ;;  %v1064_v4 = vld [vmem:[#allocation8 + $0xc8] sm:$0xff] }
 0x2b4   :  { %v3728_v12 = vunpack.i.h.bf16 %v3726_v7  ;;  %v3727_v10 = vunpack.i.l.bf16 %v3726_v7  ;;  %794 = vmatprep.subr.bf16.mxu1 %v3803_v5  ;;  %847 = vmatprep.subr.bf16.mxu0 %v3806_v1  ;;  %v299_v5 = vpack.c.bf16 %v4200_v52, %v4198_v50  ;;  %v3355_v1 = vcombine.low %v1055_v57, %v1059_v58  ;;  %v1119_v58 = vld [vmem:[#allocation8 + $0x280] sm:$0xff] }
 0x2b5   :  { %568 = vmatprep.mubr.bf16.mxu1 %v4014_v0  ;;  %621 = vmatprep.mubr.bf16.mxu0 %v4014_v0  ;;  %v3357_v7 = vcombine.low %v1056_v6, %v1060_v61  ;;  %v1123_v6 = vld [vmem:[#allocation8 + $0x2a0] sm:$0xff]  ;;  %v1120_v61 = vld [vmem:[#allocation8 + $0x288] sm:$0xff] }
 0x2b6   :  { %v297_v15 = vmax.f32 %v285_v59, %v3728_v12  ;;  %v296_v16 = vmax.f32 %v284_v56, %v3727_v10  ;;  %v3341_v56 = vcombine.low %v1040_v42, %v1044_v43  ;;  %v3348_v59 = vcombine.high %v1047_v48, %v1051_v49  ;;  %v1075_v12 = vld [vmem:[#allocation8 + $0x120] sm:$0xff]  ;;  %v1072_v10 = vld [vmem:[#allocation8 + $0x108] sm:$0xff] }
 0x2b7   :  { %795 = vmatpush1.bf16.msra.mxu1 %v3801_v8  ;;  %848 = vmatpush1.bf16.msra.mxu0 %v3804_v11  ;;  %v3366_v8 = vcombine.high %v1064_v4, %v1068_v63  ;;  %v1071_v11 = vld [vmem:[#allocation8 + $0x100] sm:$0xff] }
 0x2b8   :  { %796 = vmatprep.subr.bf16.mxu1 %v3809_v13  ;;  %849 = vmatprep.subr.bf16.mxu0 %v3812_v14  ;;  %v301_v19 = vpack.c.bf16 %v297_v15, %v296_v16  ;;  %v1076_v13 = vld [vmem:[#allocation8 + $0x128] sm:$0xff]  ;;  %v3363_v14 = vcombine.low %v1063_v3, %v1067_v9  ;;  %v3365_v15 = vcombine.low %v1064_v4, %v1068_v63  ;;  %v1079_v16 = vld [vmem:[#allocation8 + $0x140] sm:$0xff] }
 0x2b9   :  { %v3372_v50 = vcombine.high %v1071_v11, %v1075_v12  ;;  %v3374_v52 = vcombine.high %v1072_v10, %v1076_v13  ;;  %v1103_v42 = vld [vmem:[#allocation8 + $0x200] sm:$0xff]  ;;  %v1128_v63 = vld [vmem:[#allocation8 + $0x2c8] sm:$0xff] }
 0x2ba   :  { %569 = vmatmul.mubr.bf16.gmra.mrb[4].mxu1 %v301_v19  ;;  %622 = vmatmul.mubr.bf16.gmra.mrb[12].mxu0 %v301_v19  ;;  %v1084_v19 = vld [vmem:[#allocation8 + $0x168] sm:$0xff]  ;;  %v1107_v43 = vld [vmem:[#allocation8 + $0x220] sm:$0xff] }
 0x2bb   :  { %797 = vmatpush1.bf16.msra.mxu1 %v3807_v17  ;;  %850 = vmatpush1.bf16.msra.mxu0 %v3810_v18  ;;  %v1083_v17 = vld [vmem:[#allocation8 + $0x160] sm:$0xff]  ;;  %v1080_v18 = vld [vmem:[#allocation8 + $0x148] sm:$0xff]  ;;  %v3404_v48 = vcombine.high %v1103_v42, %v1107_v43 }
 0x2bc   :  { %798 = vmatprep.subr.bf16.mxu1 %v3815_v20  ;;  %851 = vmatprep.subr.bf16.mxu0 %v3818_v21  ;;  %v3371_v20 = vcombine.low %v1071_v11, %v1075_v12  ;;  %v3373_v21 = vcombine.low %v1072_v10, %v1076_v13  ;;  %v1131_v4 = vld [vmem:[#allocation8 + $0x2e0] sm:$0xff]  ;;  %v1136_v10 = vld [vmem:[#allocation8 + $0x308] sm:$0xff] }
 0x2bd   :  { %824 = vmatprep.mubr.bf16.mxu1 %v4014_v0  ;;  %877 = vmatprep.mubr.bf16.mxu0 %v4014_v0  ;;  %v1135_v11 = vld [vmem:[#allocation8 + $0x300] sm:$0xff]  ;;  %v1140_v13 = vld [vmem:[#allocation8 + $0x328] sm:$0xff] }
 0x2be   :  { %v1139_v12 = vld [vmem:[#allocation8 + $0x320] sm:$0xff] }
 0x2bf   :  { %799 = vmatpush1.bf16.msra.mxu1 %v3813_v22  ;;  %852 = vmatpush1.bf16.msra.mxu0 %v3816_v23  ;;  %v3380_v22 = vcombine.high %v1079_v16, %v1083_v17  ;;  %v3382_v23 = vcombine.high %v1080_v18, %v1084_v19 }
 0x2c0   :  { %800 = vmatprep.subr.bf16.mxu1 %v3821_v24  ;;  %853 = vmatprep.subr.bf16.mxu0 %v3824_v25  ;;  %v1087_v24 = vld [vmem:[#allocation8 + $0x180] sm:$0xff] }
 0x2c1   :  { %v1091_v25 = vld [vmem:[#allocation8 + $0x1a0] sm:$0xff] }
 0x2c3   :  { %801 = vmatpush1.bf16.msra.mxu1 %v3819_v26  ;;  %854 = vmatpush1.bf16.msra.mxu0 %v3822_v27  ;;  %v1088_v26 = vld [vmem:[#allocation8 + $0x188] sm:$0xff] }
 0x2c4   :  { %802 = vmatprep.subr.bf16.mxu1 %v3827_v28  ;;  %855 = vmatprep.subr.bf16.mxu0 %v3830_v29  ;;  %v1092_v27 = vld [vmem:[#allocation8 + $0x1a8] sm:$0xff]  ;;  %v3379_v28 = vcombine.low %v1079_v16, %v1083_v17  ;;  %v3381_v29 = vcombine.low %v1080_v18, %v1084_v19  ;;  %v1143_v16 = vld [vmem:[#allocation8 + $0x340] sm:$0xff] }
 0x2c5   :  { %v1147_v17 = vld [vmem:[#allocation8 + $0x360] sm:$0xff]  ;;  %v1144_v18 = vld [vmem:[#allocation8 + $0x348] sm:$0xff] }
 0x2c6   :  { %v1148_v19 = vld [vmem:[#allocation8 + $0x368] sm:$0xff] }
 0x2c7   :  { %803 = vmatpush1.bf16.msra.mxu1 %v3825_v30  ;;  %856 = vmatpush1.bf16.msra.mxu0 %v3828_v31  ;;  %v3388_v30 = vcombine.high %v1087_v24, %v1091_v25  ;;  %v3390_v31 = vcombine.high %v1088_v26, %v1092_v27 }
 0x2c8   :  { %804 = vmatprep.subr.bf16.mxu1 %v3833_v32  ;;  %857 = vmatprep.subr.bf16.mxu0 %v3836_v33  ;;  %v1095_v32 = vld [vmem:[#allocation8 + $0x1c0] sm:$0xff] }
 0x2c9   :  { %v1099_v33 = vld [vmem:[#allocation8 + $0x1e0] sm:$0xff] }
 0x2ca   :  { %v3396_v38 = vcombine.high %v1095_v32, %v1099_v33 }
 0x2cb   :  { %805 = vmatpush1.bf16.msra.mxu1 %v3831_v34  ;;  %858 = vmatpush1.bf16.msra.mxu0 %v3834_v35  ;;  %v1096_v34 = vld [vmem:[#allocation8 + $0x1c8] sm:$0xff] }
 0x2cc   :  { %806 = vmatprep.subr.bf16.mxu1 %v3839_v36  ;;  %859 = vmatprep.subr.bf16.mxu0 %v3842_v37  ;;  %v1100_v35 = vld [vmem:[#allocation8 + $0x1e8] sm:$0xff]  ;;  %v3387_v36 = vcombine.low %v1087_v24, %v1091_v25  ;;  %v3389_v37 = vcombine.low %v1088_v26, %v1092_v27  ;;  %v3443_v24 = vcombine.low %v1143_v16, %v1147_v17  ;;  %v1151_v26 = vld [vmem:[#allocation8 + $0x380] sm:$0xff] }
 0x2cd   :  { %v3398_v39 = vcombine.high %v1096_v34, %v1100_v35  ;;  %v3445_v25 = vcombine.low %v1144_v18, %v1148_v19  ;;  %v1155_v27 = vld [vmem:[#allocation8 + $0x3a0] sm:$0xff] }
 0x2cf   :  { %807 = vmatpush1.bf16.msra.mxu1 %v3837_v44  ;;  %860 = vmatpush1.bf16.msra.mxu0 %v3840_v45  ;;  %v1104_v44 = vld [vmem:[#allocation8 + $0x208] sm:$0xff] }
 0x2d0   :  { %2575 = vmatprep.subr.bf16.mxu1 %v3340_v46  ;;  %2681 = vmatprep.subr.bf16.mxu0 %v3342_v47  ;;  %v1108_v45 = vld [vmem:[#allocation8 + $0x228] sm:$0xff]  ;;  %v3395_v46 = vcombine.low %v1095_v32, %v1099_v33  ;;  %v3397_v47 = vcombine.low %v1096_v34, %v1100_v35  ;;  %v1159_v34 = vld [vmem:[#allocation8 + $0x3c0] sm:$0xff] }
 0x2d1   :  { %v3406_v49 = vcombine.high %v1104_v44, %v1108_v45  ;;  %v1163_v35 = vld [vmem:[#allocation8 + $0x3e0] sm:$0xff] }
 0x2d2   :  { %825 = vmatmul.mubr.bf16.vlgmr.msra.gmra.mrb[0].mxu1 %v298_v54  ;;  %878 = vmatmul.mubr.bf16.vlgmr.msra.gmra.mrb[8].mxu0 %v298_v54  ;;  %v1112_v54 = vld [vmem:[#allocation8 + $0x248] sm:$0xff] }
 0x2d3   :  { %834 = vmatprep.mubr.bf16.mxu1 %v4014_v0  ;;  %887 = vmatprep.mubr.bf16.mxu0 %v4014_v0  ;;  %v3364_v0 = vcombine.high %v1063_v3, %v1067_v9  ;;  %v1127_v9 = vld [vmem:[#allocation8 + $0x2c0] sm:$0xff] }
 0x2d4   :  { %2576 = vmatpush1.bf16.msra.mxu1 %v3339_v55  ;;  %2682 = vmatpush1.bf16.msra.mxu0 %v3341_v56  ;;  %v1116_v55 = vld [vmem:[#allocation8 + $0x268] sm:$0xff]  ;;  %v3403_v56 = vcombine.low %v1103_v42, %v1107_v43 }
 0x2d5   :  { %2577 = vmatprep.subr.bf16.mxu1 %v3348_v59  ;;  %2683 = vmatprep.subr.bf16.mxu0 %v3350_v60  ;;  %v3405_v59 = vcombine.low %v1104_v44, %v1108_v45  ;;  %v3412_v60 = vcombine.high %v1111_v51, %v1115_v53  ;;  %v3414_v57 = vcombine.high %v1112_v54, %v1116_v55  ;;  %v4243_v44 = vld [vmem:[#allocation8 + $0x400] sm:$0xff] }
 0x2d6   :  { %v4245_v45 = vld [vmem:[#allocation8 + $0x420] sm:$0xff] }
 0x2d8   :  { %2578 = vmatpush1.bf16.msra.mxu1 %v3347_v62  ;;  %2684 = vmatpush1.bf16.msra.mxu0 %v3349_v40  ;;  %v1124_v62 = vld [vmem:[#allocation8 + $0x2a8] sm:$0xff]  ;;  %v3411_v40 = vcombine.low %v1111_v51, %v1115_v53 }
 0x2d9   :  { %2579 = vmatprep.subr.bf16.mxu1 %v3356_v41  ;;  %2685 = vmatprep.subr.bf16.mxu0 %v3358_v2  ;;  %v3413_v41 = vcombine.low %v1112_v54, %v1116_v55  ;;  %v3420_v2 = vcombine.high %v1119_v58, %v1123_v6  ;;  %v3422_v3 = vcombine.high %v1120_v61, %v1124_v62  ;;  %v898_v54 = vlaneseq }
 0x2da   :  { %835 = vmatmul.mubr.bf16.gmra.mrb[4].mxu1 %v299_v5  ;;  %888 = vmatmul.mubr.bf16.gmra.mrb[12].mxu0 %v299_v5  ;;  %v1132_v5 = vld [vmem:[#allocation8 + $0x2e8] sm:$0xff] }
 0x2db   :  { %v4259_v55 = vand.u32 127, %v898_v54 }
 0x2dc   :  { %2580 = vmatpush1.bf16.msra.mxu1 %v3355_v1  ;;  %2686 = vmatpush1.bf16.msra.mxu0 %v3357_v7  ;;  %v3419_v1 = vcombine.low %v1119_v58, %v1123_v6  ;;  %v3421_v7 = vcombine.low %v1120_v61, %v1124_v62  ;;  %v951_v61 = vld [vmem:[%s4683_s8] sm:$0xf] }
 0x2dd   :  { %2581 = vmatprep.subr.bf16.mxu1 %v3364_v0  ;;  %2687 = vmatprep.subr.bf16.mxu0 %v3366_v8  ;;  %v3428_v0 = vcombine.high %v1127_v9, %v1131_v4  ;;  %v3430_v8 = vcombine.high %v1128_v63, %v1132_v5  ;;  %v4262_v58 = vadd.s32 256, %v4259_v55  ;;  %v4268_v62 = vadd.s32 128, %v4259_v55 }
 0x2e0   :  { %2582 = vmatpush1.bf16.msra.mxu1 %v3363_v14  ;;  %2688 = vmatpush1.bf16.msra.mxu0 %v3365_v15  ;;  %v3427_v14 = vcombine.low %v1127_v9, %v1131_v4  ;;  %v3429_v15 = vcombine.low %v1128_v63, %v1132_v5  ;;  %v4281_v63 = vld [vmem:[#allocation8 + $0x440] sm:$0xff] }
 0x2e1   :  { %2583 = vmatprep.subr.bf16.mxu1 %v3372_v50  ;;  %2689 = vmatprep.subr.bf16.mxu0 %v3374_v52  ;;  %v3436_v50 = vcombine.high %v1135_v11, %v1139_v12  ;;  %v3438_v52 = vcombine.high %v1136_v10, %v1140_v13  ;;  %v4283_v5 = vld [vmem:[#allocation8 + $0x460] sm:$0xff] }
 0x2e4   :  { %2584 = vmatpush1.bf16.msra.mxu1 %v3371_v20  ;;  %2690 = vmatpush1.bf16.msra.mxu0 %v3373_v21  ;;  %v3435_v20 = vcombine.low %v1135_v11, %v1139_v12  ;;  %v3437_v21 = vcombine.low %v1136_v10, %v1140_v13 }
 0x2e5   :  { %2585 = vmatprep.subr.bf16.mxu1 %v3380_v22  ;;  %2691 = vmatprep.subr.bf16.mxu0 %v3382_v23  ;;  %v3444_v22 = vcombine.high %v1143_v16, %v1147_v17  ;;  %v3446_v23 = vcombine.high %v1144_v18, %v1148_v19 }
 0x2e8   :  { %2586 = vmatpush1.bf16.msra.mxu1 %v3379_v28  ;;  %2692 = vmatpush1.bf16.msra.mxu0 %v3381_v29  ;;  %v1152_v28 = vld [vmem:[#allocation8 + $0x388] sm:$0xff]  ;;  %v3452_v29 = vcombine.high %v1151_v26, %v1155_v27 }
 0x2e9   :  { %2587 = vmatprep.subr.bf16.mxu1 %v3388_v30  ;;  %2693 = vmatprep.subr.bf16.mxu0 %v3390_v31  ;;  %v1156_v30 = vld [vmem:[#allocation8 + $0x3a8] sm:$0xff]  ;;  %v3451_v31 = vcombine.low %v1151_v26, %v1155_v27 }
 0x2ea   :  { %v3453_v32 = vcombine.low %v1152_v28, %v1156_v30  ;;  %v3454_v33 = vcombine.high %v1152_v28, %v1156_v30 }
 0x2ec   :  { %2588 = vmatpush1.bf16.msra.mxu1 %v3387_v36  ;;  %2694 = vmatpush1.bf16.msra.mxu0 %v3389_v37  ;;  %v1160_v36 = vld [vmem:[#allocation8 + $0x3c8] sm:$0xff]  ;;  %v3460_v37 = vcombine.high %v1159_v34, %v1163_v35 }
 0x2ed   :  { %2589 = vmatprep.subr.bf16.mxu1 %v3396_v38  ;;  %2695 = vmatprep.subr.bf16.mxu0 %v3398_v39  ;;  %v1164_v38 = vld [vmem:[#allocation8 + $0x3e8] sm:$0xff]  ;;  %v3459_v39 = vcombine.low %v1159_v34, %v1163_v35 }
 0x2ee   :  { %v3461_v42 = vcombine.low %v1160_v36, %v1164_v38  ;;  %v3462_v43 = vcombine.high %v1160_v36, %v1164_v38 }
 0x2f0   :  { %2590 = vmatpush1.bf16.msra.mxu1 %v3395_v46  ;;  %2696 = vmatpush1.bf16.msra.mxu0 %v3397_v47  ;;  %v4247_v46 = vld [vmem:[#allocation8 + $0x408] sm:$0xff]  ;;  %v3468_v47 = vcombine.high %v4243_v44, %v4245_v45 }
 0x2f1   :  { %2591 = vmatprep.subr.bf16.mxu1 %v3404_v48  ;;  %2697 = vmatprep.subr.bf16.mxu0 %v3406_v49  ;;  %v4251_v48 = vld [vmem:[#allocation8 + $0x428] sm:$0xff]  ;;  %v3467_v49 = vcombine.low %v4243_v44, %v4245_v45 }
 0x2f2   :  { %v3469_v51 = vcombine.low %v4247_v46, %v4251_v48  ;;  %v3470_v53 = vcombine.high %v4247_v46, %v4251_v48 }
 0x2f4   :  { %2592 = vmatpush1.bf16.msra.mxu1 %v3403_v56  ;;  %2698 = vmatpush1.bf16.msra.mxu0 %v3405_v59  ;;  %v954_v56 = vshrl.u32 %v898_v54, 7  ;;  %v909_v59 = vpop.permute.xlu0 %908 }
 0x2f5   :  { %2593 = vmatprep.subr.bf16.mxu1 %v3412_v60  ;;  %2699 = vmatprep.subr.bf16.mxu0 %v3414_v57  ;;  %v912_v60 = vpop.permute.xlu1 %911  ;;  %vm919_vm1 = vcmp.lt.s32.totalorder %v4259_v55, %v909_v59  ;;  %vm921_vm2 = vcmp.lt.s32.totalorder %v4262_v58, %v909_v59  ;;  %vm920_vm3 = vcmp.lt.s32.totalorder %v4268_v62, %v909_v59 }
 0x2f6   :  { %v955_v57 = vsub.s32 0, %v954_v56  ;;  %v963_v6 = vsub.s32 2, %v954_v56  ;;  %vm923_vm5 = vcmp.lt.s32.totalorder %v4259_v55, %v912_v60  ;;  %vm925_vm6 = vcmp.lt.s32.totalorder %v4262_v58, %v912_v60 }
 0x2f7   :  { %vm924_vm7 = vcmp.lt.s32.totalorder %v4268_v62, %v912_v60 }
 0x2f8   :  { %2594 = vmatpush1.bf16.msra.mxu1 %v3411_v40  ;;  %2700 = vmatpush1.bf16.msra.mxu0 %v3413_v41  ;;  %v959_v40 = vsub.s32 1, %v954_v56  ;;  %v4271_v41 = vadd.s32 384, %v4259_v55  ;;  %v4276_v9 = vrot.slane %v951_v61, %v955_v57  ;;  %v4279_v4 = vrot.slane %v951_v61, %v963_v6 }
 0x2f9   :  { %2595 = vmatprep.subr.bf16.mxu1 %v3420_v2  ;;  %2701 = vmatprep.subr.bf16.mxu0 %v3422_v3  ;;  %v967_v2 = vsub.s32 3, %v954_v56  ;;  %v4273_v3 = vpop.permute.xlu0 %914 }
 0x2fa   :  { %vm922_vm4 = vcmp.lt.s32.totalorder %v4271_v41, %v909_v59  ;;  %vm926_vm8 = vcmp.lt.s32.totalorder %v4271_v41, %v912_v60  ;;  %vm927_vm9 = vcmp.lt.s32.totalorder %v4259_v55, %v4273_v3  ;;  %vm929_vm10 = vcmp.lt.s32.totalorder %v4262_v58, %v4273_v3 }
 0x2fb   :  { %vm928_vm11 = vcmp.lt.s32.totalorder %v4268_v62, %v4273_v3  ;;  %vm930_vm12 = vcmp.lt.s32.totalorder %v4271_v41, %v4273_v3 }
 0x2fc   :  { %2596 = vmatpush1.bf16.msra.mxu1 %v3419_v1  ;;  %2702 = vmatpush1.bf16.msra.mxu0 %v3421_v7  ;;  %v4285_v1 = vpop.permute.xlu1 %917  ;;  %v4288_v7 = vrot.slane %v951_v61, %v959_v40 }
 0x2fd   :  { %2597 = vmatprep.subr.bf16.mxu1 %v3428_v0  ;;  %2703 = vmatprep.subr.bf16.mxu0 %v3430_v8  ;;  %v4291_v0 = vrot.slane %v951_v61, %v967_v2  ;;  %vm931_vm13 = vcmp.lt.s32.totalorder %v4259_v55, %v4285_v1  ;;  %vm933_vm14 = vcmp.lt.s32.totalorder %v4262_v58, %v4285_v1 }
 0x2fe   :  { %vm932_vm15 = vcmp.lt.s32.totalorder %v4268_v62, %v4285_v1  ;;  %vm934_vm0 = vcmp.lt.s32.totalorder %v4271_v41, %v4285_v1 }
 0x300   :  { %2598 = vmatpush1.bf16.msra.mxu1 %v3427_v14  ;;  %2704 = vmatpush1.bf16.msra.mxu0 %v3429_v15  ;;  %v3475_v15 = vcombine.low %v4281_v63, %v4283_v5 }
 0x301   :  { %2599 = vmatprep.subr.bf16.mxu1 %v3436_v50  ;;  %2705 = vmatprep.subr.bf16.mxu0 %v3438_v52  ;;  %v3476_v50 = vcombine.high %v4281_v63, %v4283_v5 }
 0x304   :  { %2600 = vmatpush1.bf16.msra.mxu1 %v3435_v20  ;;  %2706 = vmatpush1.bf16.msra.mxu0 %v3437_v21 }
 0x305   :  { %2601 = vmatprep.subr.bf16.mxu1 %v3444_v22  ;;  %2707 = vmatprep.subr.bf16.mxu0 %v3446_v23 }
 0x308   :  { %2602 = vmatpush1.bf16.msra.mxu1 %v3443_v24  ;;  %2708 = vmatpush1.bf16.msra.mxu0 %v3445_v25 }
 0x309   :  { %2603 = vmatprep.subr.bf16.mxu1 %v3452_v29  ;;  %2709 = vmatprep.subr.bf16.mxu0 %v3454_v33 }
 0x30c   :  { %2604 = vmatpush1.bf16.msra.mxu1 %v3451_v31  ;;  %2710 = vmatpush1.bf16.msra.mxu0 %v3453_v32  ;;  %v4333_v31 = vld [vmem:[#allocation8 + $0x448] sm:$0xff] }
 0x30d   :  { %2605 = vmatprep.subr.bf16.mxu1 %v3460_v37  ;;  %2711 = vmatprep.subr.bf16.mxu0 %v3462_v43  ;;  %v4335_v32 = vld [vmem:[#allocation8 + $0x468] sm:$0xff] }
 0x30e   :  { %v3478_v54 = vcombine.high %v4333_v31, %v4335_v32 }
 0x310   :  { %2606 = vmatpush1.bf16.msra.mxu1 %v3459_v39  ;;  %2712 = vmatpush1.bf16.msra.mxu0 %v3461_v42 }
 0x311   :  { %2628 = vmatprep.subr.bf16.mxu1 %v3468_v47  ;;  %2734 = vmatprep.subr.bf16.mxu0 %v3470_v53  ;;  %v3477_v53 = vcombine.low %v4333_v31, %v4335_v32 }
 0x3a5   :  { %v826_v8 = vpop.f32.mrb[0].mxu1  ;;  %v879_v11 = vpop.f32.mrb[8].mxu0 }
 0x3a6   :  { %v935_v12 = vsel %vm919_vm1, %v826_v8, 0.0  ;;  %v937_v10 = vsel %vm921_vm2, %v879_v11, 0.0  ;;  %v828_v13 = vpop.f32.mrb[1].mxu1  ;;  %v881_v14 = vpop.f32.mrb[9].mxu0 }
 0x3a7   :  { %v973_v52 = vadd.f32 %v4276_v9, %v935_v12  ;;  %v975_v16 = vadd.f32 %v4279_v4, %v937_v10  ;;  %v936_v17 = vsel %vm920_vm3, %v828_v13, 0.0  ;;  %v938_v18 = vsel %vm922_vm4, %v881_v14, 0.0  ;;  %v830_v19 = vpop.f32.mrb[2].mxu1  ;;  %v883_v20 = vpop.f32.mrb[10].mxu0 }
 0x3a8   :  { %v974_v21 = vadd.f32 %v4288_v7, %v936_v17  ;;  %v976_v22 = vadd.f32 %v4291_v0, %v938_v18  ;;  %v939_v23 = vsel %vm923_vm5, %v830_v19, 0.0  ;;  %v941_v24 = vsel %vm925_vm6, %v883_v20, 0.0  ;;  %v832_v25 = vpop.f32.mrb[3].mxu1  ;;  %v885_v26 = vpop.f32.mrb[11].mxu0 }
 0x3a9   :  { %v989_v27 = vmax.f32 %v973_v52, 0.0  ;;  %v991_v28 = vmax.f32 %v975_v16, 0.0  ;;  %v977_v29 = vadd.f32 %v4276_v9, %v939_v23  ;;  %v979_v30 = vadd.f32 %v4279_v4, %v941_v24 }
 0x3aa   :  { %v990_v33 = vmax.f32 %v974_v21, 0.0  ;;  %v992_v34 = vmax.f32 %v976_v22, 0.0  ;;  %v940_v35 = vsel %vm924_vm7, %v832_v25, 0.0  ;;  %v942_v36 = vsel %vm926_vm8, %v885_v26, 0.0 }
 0x3ab   :  { %v1013_v37 = vmax.f32 %v989_v27, %v991_v28  ;;  %v993_v38 = vmax.f32 %v977_v29, 0.0  ;;  %v995_v39 = vmax.f32 %v979_v30, 0.0  ;;  %v978_v42 = vadd.f32 %v4288_v7, %v940_v35  ;;  %v1183_v29 = vld [vmem:[#allocation8 + $0x480] sm:$0xff] }
 0x3ac   :  { %v1014_v43 = vmax.f32 %v990_v33, %v992_v34  ;;  %v980_v47 = vadd.f32 %v4291_v0, %v942_v36  ;;  %v1187_v30 = vld [vmem:[#allocation8 + $0x4a0] sm:$0xff] }
 0x3ad   :  { %v4349_v56 = vpack.c.bf16 %v993_v38, %v989_v27  ;;  %v4351_v59 = vpack.c.bf16 %v995_v39, %v991_v28  ;;  %v1015_v60 = vmax.f32 %v993_v38, %v995_v39  ;;  %v994_v57 = vmax.f32 %v978_v42, 0.0  ;;  %v836_v6 = vpop.f32.mrb[4].mxu1  ;;  %v889_v61 = vpop.f32.mrb[12].mxu0  ;;  %v1188_v42 = vld [vmem:[#allocation8 + $0x4a8] sm:$0xff] }
 0x3ae   :  { %v996_v40 = vmax.f32 %v980_v47, 0.0  ;;  %v943_v2 = vsel %vm927_vm9, %v836_v6, 0.0  ;;  %v945_v8 = vsel %vm929_vm10, %v889_v61, 0.0  ;;  %v838_v11 = vpop.f32.mrb[5].mxu1  ;;  %v891_v12 = vpop.f32.mrb[13].mxu0  ;;  %v4359_v10 = vmax.f32 %v1013_v37, %v1014_v43 }
 0x3af   :  { %v4361_v13 = vpack.c.bf16 %v994_v57, %v990_v33  ;;  %v981_v14 = vadd.f32 %v4276_v9, %v943_v2  ;;  %v983_v52 = vadd.f32 %v4279_v4, %v945_v8  ;;  %v944_v16 = vsel %vm928_vm11, %v838_v11, 0.0  ;;  %v840_v17 = vpop.f32.mrb[6].mxu1  ;;  %v893_v18 = vpop.f32.mrb[14].mxu0  ;;  %v1196_v2 = vld [vmem:[#allocation8 + $0x4e8] sm:$0xff]  ;;  %v3859_v8 = vld [vmem:[%s4676_s1] sm:$0xff] }
 0x3b0   :  { %v4368_v19 = vpack.c.bf16 %v996_v40, %v992_v34  ;;  %v1016_v20 = vmax.f32 %v994_v57, %v996_v40  ;;  %v982_v21 = vadd.f32 %v4288_v7, %v944_v16  ;;  %v946_v22 = vsel %vm930_vm12, %v891_v12, 0.0  ;;  %v842_v23 = vpop.f32.mrb[7].mxu1  ;;  %v895_v24 = vpop.f32.mrb[15].mxu0  ;;  %v1204_v16 = vld [vmem:[#allocation8 + $0x528] sm:$0xff] }
 0x3b1   :  { %v997_v25 = vmax.f32 %v981_v14, 0.0  ;;  %v999_v26 = vmax.f32 %v983_v52, 0.0  ;;  %v984_v27 = vadd.f32 %v4291_v0, %v946_v22  ;;  %v947_v28 = vsel %vm931_vm13, %v840_v17, 0.0  ;;  %2607 = vmatprep.mubr.bf16.mxu1 %v4361_v13  ;;  %2713 = vmatprep.mubr.bf16.mxu0 %v4361_v13  ;;  %v1200_v52 = vld [vmem:[#allocation8 + $0x508] sm:$0xff] }
 0x3b2   :  { %v998_v33 = vmax.f32 %v982_v21, 0.0  ;;  %v985_v3 = vadd.f32 %v4276_v9, %v947_v28  ;;  %v949_v34 = vsel %vm933_vm14, %v893_v18, 0.0  ;;  %v948_v35 = vsel %vm932_vm15, %v842_v23, 0.0  ;;  %2608 = vmatmul.mubr.bf16.vlgmr.msra.gmra.mrb[8].mxu1 %v4349_v56  ;;  %2714 = vmatmul.mubr.bf16.vlgmr.msra.gmra.mrb[16].mxu0 %v4349_v56  ;;  %v1184_v9 = vld [vmem:[#allocation8 + $0x488] sm:$0xff] }
 0x3b3   :  { %v1017_v36 = vmax.f32 %v997_v25, %v999_v26  ;;  %v1000_v37 = vmax.f32 %v984_v27, 0.0  ;;  %v987_v38 = vadd.f32 %v4279_v4, %v949_v34  ;;  %v986_v39 = vadd.f32 %v4288_v7, %v948_v35  ;;  %2629 = vmatpush1.bf16.msra.mxu1 %v3467_v49  ;;  %2735 = vmatpush1.bf16.msra.mxu0 %v3469_v51  ;;  %v1211_v27 = vld [vmem:[#allocation8 + $0x560] sm:$0xff]  ;;  %v1208_v28 = vld [vmem:[#allocation8 + $0x548] sm:$0xff] }
 0x3b4   :  { %v1001_v43 = vmax.f32 %v985_v3, 0.0  ;;  %v950_v47 = vsel %vm934_vm0, %v895_v24, 0.0  ;;  %v4400_v57 = vmax.f32 %v1015_v60, %v1016_v20  ;;  %2630 = vmatprep.subr.bf16.mxu1 %v3476_v50  ;;  %2736 = vmatprep.subr.bf16.mxu0 %v3478_v54  ;;  %v3484_v44 = vcombine.high %v1183_v29, %v1187_v30  ;;  %v1191_v60 = vld [vmem:[#allocation8 + $0x4c0] sm:$0xff]  ;;  %v1192_v54 = vld [vmem:[#allocation8 + $0x4c8] sm:$0xff] }
 0x3b5   :  { %v1018_v45 = vmax.f32 %v998_v33, %v1000_v37  ;;  %v1003_v49 = vmax.f32 %v987_v38, 0.0  ;;  %v1002_v4 = vmax.f32 %v986_v39, 0.0  ;;  %v988_v46 = vadd.f32 %v4291_v0, %v950_v47  ;;  %v1195_v0 = vld [vmem:[#allocation8 + $0x4e0] sm:$0xff]  ;;  %v1216_v39 = vld [vmem:[#allocation8 + $0x588] sm:$0xff] }
 0x3b6   :  { %v4406_v48 = vpack.c.bf16 %v1001_v43, %v997_v25  ;;  %v3729_v51 = vpack.i.bf16 %v4400_v57, %v4359_v10  ;;  %v3483_v1 = vcombine.low %v1183_v29, %v1187_v30  ;;  %v3486_v7 = vcombine.high %v1184_v9, %v1188_v42  ;;  %v3860_v20 = vld [vmem:[%s4676_s1 + $0x10] sm:$0xff]  ;;  %v1212_v29 = vld [vmem:[#allocation8 + $0x568] sm:$0xff] }
 0x3b7   :  { %v4410_v6 = vpack.c.bf16 %v1003_v49, %v999_v26  ;;  %v1019_v61 = vmax.f32 %v1001_v43, %v1003_v49  ;;  %v4412_v40 = vpack.c.bf16 %v1002_v4, %v998_v33  ;;  %v1004_v50 = vmax.f32 %v988_v46, 0.0  ;;  %2631 = vmatpush1.bf16.msra.mxu1 %v3475_v15  ;;  %2737 = vmatpush1.bf16.msra.mxu0 %v3477_v53  ;;  %v1199_v15 = vld [vmem:[#allocation8 + $0x500] sm:$0xff]  ;;  %v3861_v33 = vld [vmem:[%s4676_s1 + $0x8] sm:$0xff]  ;;  %v3862_v43 = vld [vmem:[%s4676_s1 + $0x18] sm:$0xff] }
 0x3b8   :  { %3730 = vrot.lane.b32.xlu0 %v3729_v51, %s4010_s5  ;;  %v3003_v11 = vmul.u32 128, %v3859_v8  ;;  %2632 = vmatprep.subr.bf16.mxu1 %v3484_v44  ;;  %v3485_v12 = vcombine.low %v1184_v9, %v1188_v42  ;;  %v4424_v14 = vmax.f32 %v1017_v36, %v1018_v45  ;;  %v3492_v31 = vcombine.high %v1191_v60, %v1195_v0  ;;  %v1203_v53 = vld [vmem:[#allocation8 + $0x520] sm:$0xff]  ;;  %v1220_v9 = vld [vmem:[#allocation8 + $0x5a8] sm:$0xff] }
 0x3b9   :  { %v4426_v63 = vpack.c.bf16 %v1004_v50, %v1000_v37  ;;  %v1020_v5 = vmax.f32 %v1002_v4, %v1004_v50  ;;  %2617 = vmatprep.mubr.bf16.mxu1 %v4412_v40  ;;  %2723 = vmatprep.mubr.bf16.mxu0 %v4412_v40  ;;  %v3494_v32 = vcombine.high %v1192_v54, %v1196_v2  ;;  %v3005_v21 = vmul.u32 128, %v3860_v20  ;;  %v1207_v26 = vld [vmem:[#allocation8 + $0x540] sm:$0xff]  ;;  %v1224_v51 = vld [vmem:[#allocation8 + $0x5c8] sm:$0xff] }
 0x3ba   :  { %2738 = vmatprep.subr.bf16.mxu0 %v3486_v7  ;;  %2618 = vmatmul.mubr.bf16.gmra.mrb[12].mxu1 %v4406_v48  ;;  %v3491_v17 = vcombine.low %v1191_v60, %v1195_v0  ;;  %v3493_v22 = vcombine.low %v1192_v54, %v1196_v2  ;;  %v3500_v24 = vcombine.high %v1199_v15, %v1203_v53  ;;  %v3004_v3 = vmul.u32 128, %v3861_v33  ;;  %v1215_v37 = vld [vmem:[#allocation8 + $0x580] sm:$0xff]  ;;  %v1232_v2 = vld [vmem:[#allocation8 + $0x608] sm:$0xff] }
 0x3bb   :  { %2633 = vmatpush1.bf16.msra.mxu1 %v3483_v1  ;;  %2724 = vmatmul.mubr.bf16.gmra.mrb[20].mxu0 %v4406_v48  ;;  %v4432_v18 = vmax.f32 %v1019_v61, %v1020_v5  ;;  %v3502_v25 = vcombine.high %v1200_v52, %v1204_v16  ;;  %v3499_v30 = vcombine.low %v1199_v15, %v1203_v53  ;;  %v1219_v38 = vld [vmem:[#allocation8 + $0x5a0] sm:$0xff]  ;;  %v3006_v47 = vmul.u32 128, %v3862_v43  ;;  %v1228_v1 = vld [vmem:[#allocation8 + $0x5e8] sm:$0xff] }
 0x3bc   :  { %3008 = vperm.xlu0 %3697, %v3003_v11   ;;  %2739 = vmatpush1.bf16.msra.mxu0 %v3485_v12  ;;  %v3501_v34 = vcombine.low %v1200_v52, %v1204_v16  ;;  %v3508_v35 = vcombine.high %v1207_v26, %v1211_v27  ;;  %v3510_v36 = vcombine.high %v1208_v28, %v1212_v29  ;;  %v1223_v4 = vld [vmem:[#allocation8 + $0x5c0] sm:$0xff]  ;;  %v1236_v8 = vld [vmem:[#allocation8 + $0x628] sm:$0xff] }
 0x3bd   :  { %2660 = vmatprep.mubr.bf16.mxu1 %v4368_v19  ;;  %2766 = vmatprep.mubr.bf16.mxu0 %v4368_v19  ;;  %v3734_v23 = vpack.i.bf16 %v4432_v18, %v4424_v14  ;;  %v3507_v42 = vcombine.low %v1207_v26, %v1211_v27  ;;  %v3509_v44 = vcombine.low %v1208_v28, %v1212_v29  ;;  %v1227_v46 = vld [vmem:[#allocation8 + $0x5e0] sm:$0xff]  ;;  %v1240_v53 = vld [vmem:[#allocation8 + $0x648] sm:$0xff] }
 0x3be   :  { %2634 = vmatprep.subr.bf16.mxu1 %v3492_v31  ;;  %2740 = vmatprep.subr.bf16.mxu0 %v3494_v32  ;;  %v3516_v45 = vcombine.high %v1215_v37, %v1219_v38  ;;  %v3518_v49 = vcombine.high %v1216_v39, %v1220_v9  ;;  %v3515_v7 = vcombine.low %v1215_v37, %v1219_v38  ;;  %v1231_v0 = vld [vmem:[#allocation8 + $0x600] sm:$0xff]  ;;  %v1244_v52 = vld [vmem:[#allocation8 + $0x668] sm:$0xff] }
 0x3bf   :  { %3735 = vrot.lane.b32.xlu1 %v3734_v23, %s4010_s5  ;;  %2635 = vmatpush1.bf16.msra.mxu1 %v3491_v17  ;;  %v3517_v60 = vcombine.low %v1216_v39, %v1220_v9  ;;  %v3524_v61 = vcombine.high %v1223_v4, %v1227_v46  ;;  %v3526_v50 = vcombine.high %v1224_v51, %v1228_v1  ;;  %v1235_v54 = vld [vmem:[#allocation8 + $0x620] sm:$0xff]  ;;  %v1268_v43 = vld [vmem:[#allocation8 + $0x728] sm:$0xff] }
 0x3c0   :  { %3014 = vperm.xlu0 %3697, %v3005_v21   ;;  %2741 = vmatpush1.bf16.msra.mxu0 %v3493_v22  ;;  %v3523_v11 = vcombine.low %v1223_v4, %v1227_v46  ;;  %v3525_v12 = vcombine.low %v1224_v51, %v1228_v1  ;;  %v3532_v5 = vcombine.high %v1231_v0, %v1235_v54  ;;  %v1239_v31 = vld [vmem:[#allocation8 + $0x640] sm:$0xff]  ;;  %v1272_v51 = vld [vmem:[#allocation8 + $0x748] sm:$0xff] }
 0x3c1   :  { %2636 = vmatprep.subr.bf16.mxu1 %v3500_v24  ;;  %2742 = vmatprep.subr.bf16.mxu0 %v3502_v25  ;;  %v3534_v15 = vcombine.high %v1232_v2, %v1236_v8  ;;  %v1243_v32 = vld [vmem:[#allocation8 + $0x660] sm:$0xff]  ;;  %v3531_v16 = vcombine.low %v1231_v0, %v1235_v54  ;;  %v3533_v17 = vcombine.low %v1232_v2, %v1236_v8  ;;  %v1248_v24 = vld [vmem:[#allocation8 + $0x688] sm:$0xff] }
 0x3c2   :  { %v3540_v20 = vcombine.high %v1239_v31, %v1243_v32  ;;  %v3542_v21 = vcombine.high %v1240_v53, %v1244_v52  ;;  %v1247_v22 = vld [vmem:[#allocation8 + $0x680] sm:$0xff]  ;;  %v1252_v25 = vld [vmem:[#allocation8 + $0x6a8] sm:$0xff]  ;;  %v3539_v26 = vcombine.low %v1239_v31, %v1243_v32  ;;  %v3541_v27 = vcombine.low %v1240_v53, %v1244_v52 }
 0x3c3   :  { %3011 = vperm.xlu1 %3698, %v3004_v3   ;;  %2637 = vmatpush1.bf16.msra.mxu1 %v3499_v30  ;;  %v1251_v23 = vld [vmem:[#allocation8 + $0x6a0] sm:$0xff]  ;;  %v3550_v29 = vcombine.high %v1248_v24, %v1252_v25  ;;  %v1256_v3 = vld [vmem:[#allocation8 + $0x6c8] sm:$0xff] }
 0x3c4   :  { %2743 = vmatpush1.bf16.msra.mxu0 %v3501_v34  ;;  %2638 = vmatprep.subr.bf16.mxu1 %v3508_v35  ;;  %v3548_v28 = vcombine.high %v1247_v22, %v1251_v23  ;;  %v1255_v30 = vld [vmem:[#allocation8 + $0x6c0] sm:$0xff]  ;;  %v1260_v34 = vld [vmem:[#allocation8 + $0x6e8] sm:$0xff]  ;;  %v3547_v35 = vcombine.low %v1247_v22, %v1251_v23  ;;  %v1041_v22 = vld [vmem:[#allocation8 + $0x10] sm:$0xff] }
 0x3c5   :  { %2744 = vmatprep.subr.bf16.mxu0 %v3510_v36  ;;  %v1259_v33 = vld [vmem:[#allocation8 + $0x6e0] sm:$0xff]  ;;  %v3549_v36 = vcombine.low %v1248_v24, %v1252_v25  ;;  %v3558_v38 = vcombine.high %v1256_v3, %v1260_v34  ;;  %v1276_v1 = vld [vmem:[#allocation8 + $0x768] sm:$0xff]  ;;  %v1045_v23 = vld [vmem:[#allocation8 + $0x30] sm:$0xff] }
 0x3c6   :  { %v3556_v37 = vcombine.high %v1255_v30, %v1259_v33  ;;  %v1263_v39 = vld [vmem:[#allocation8 + $0x700] sm:$0xff]  ;;  %v1280_v2 = vld [vmem:[#allocation8 + $0x788] sm:$0xff]  ;;  %v1042_v24 = vld [vmem:[#allocation8 + $0x18] sm:$0xff] }
 0x3c7   :  { %3017 = vperm.xlu1 %3698, %v3006_v47   ;;  %2639 = vmatpush1.bf16.msra.mxu1 %v3507_v42  ;;  %v1267_v9 = vld [vmem:[#allocation8 + $0x720] sm:$0xff]  ;;  %v1264_v42 = vld [vmem:[#allocation8 + $0x708] sm:$0xff]  ;;  %v3555_v47 = vcombine.low %v1255_v30, %v1259_v33  ;;  %v1046_v25 = vld [vmem:[#allocation8 + $0x38] sm:$0xff] }
 0x3c8   :  { %2745 = vmatpush1.bf16.msra.mxu0 %v3509_v44  ;;  %2640 = vmatprep.subr.bf16.mxu1 %v3516_v45  ;;  %v3557_v44 = vcombine.low %v1256_v3, %v1260_v34  ;;  %v3564_v45 = vcombine.high %v1263_v39, %v1267_v9  ;;  %v1271_v4 = vld [vmem:[#allocation8 + $0x740] sm:$0xff]  ;;  %v1284_v8 = vld [vmem:[#allocation8 + $0x7a8] sm:$0xff]  ;;  %v1049_v30 = vld [vmem:[#allocation8 + $0x50] sm:$0xff] }
 0x3c9   :  { %2746 = vmatprep.subr.bf16.mxu0 %v3518_v49  ;;  %v3566_v49 = vcombine.high %v1264_v42, %v1268_v43  ;;  %v1275_v46 = vld [vmem:[#allocation8 + $0x760] sm:$0xff]  ;;  %v1288_v53 = vld [vmem:[#allocation8 + $0x7c8] sm:$0xff]  ;;  %v1053_v33 = vld [vmem:[#allocation8 + $0x70] sm:$0xff] }
 0x3ca   :  { %v1279_v0 = vld [vmem:[#allocation8 + $0x780] sm:$0xff]  ;;  %v1292_v52 = vld [vmem:[#allocation8 + $0x7e8] sm:$0xff]  ;;  %v1050_v3 = vld [vmem:[#allocation8 + $0x58] sm:$0xff] }
 0x3cb   :  { %2641 = vmatpush1.bf16.msra.mxu1 %v3515_v7  ;;  %v3563_v7 = vcombine.low %v1263_v39, %v1267_v9  ;;  %v1283_v54 = vld [vmem:[#allocation8 + $0x7a0] sm:$0xff]  ;;  %v1054_v34 = vld [vmem:[#allocation8 + $0x78] sm:$0xff]  ;;  %v1057_v39 = vld [vmem:[#allocation8 + $0x90] sm:$0xff] }
 0x3cc   :  { %2747 = vmatpush1.bf16.msra.mxu0 %v3517_v60  ;;  %2642 = vmatprep.subr.bf16.mxu1 %v3524_v61  ;;  %v3565_v60 = vcombine.low %v1264_v42, %v1268_v43  ;;  %v3572_v61 = vcombine.high %v1271_v4, %v1275_v46  ;;  %v1287_v31 = vld [vmem:[#allocation8 + $0x7c0] sm:$0xff]  ;;  %v1061_v9 = vld [vmem:[#allocation8 + $0xb0] sm:$0xff]  ;;  %v1058_v42 = vld [vmem:[#allocation8 + $0x98] sm:$0xff] }
 0x3cd   :  { %2748 = vmatprep.subr.bf16.mxu0 %v3526_v50  ;;  %v3574_v50 = vcombine.high %v1272_v51, %v1276_v1  ;;  %v1291_v32 = vld [vmem:[#allocation8 + $0x7e0] sm:$0xff]  ;;  %v1062_v43 = vld [vmem:[#allocation8 + $0xb8] sm:$0xff] }
 0x3cf   :  { %2643 = vmatpush1.bf16.msra.mxu1 %v3523_v11  ;;  %v3571_v11 = vcombine.low %v1271_v4, %v1275_v46  ;;  %v1065_v4 = vld [vmem:[#allocation8 + $0xd0] sm:$0xff] }
 0x3d0   :  { %2749 = vmatpush1.bf16.msra.mxu0 %v3525_v12  ;;  %2644 = vmatprep.subr.bf16.mxu1 %v3532_v5  ;;  %v3573_v12 = vcombine.low %v1272_v51, %v1276_v1  ;;  %v3580_v5 = vcombine.high %v1279_v0, %v1283_v54  ;;  %v1069_v46 = vld [vmem:[#allocation8 + $0xf0] sm:$0xff]  ;;  %v1066_v51 = vld [vmem:[#allocation8 + $0xd8] sm:$0xff] }
 0x3d1   :  { %2750 = vmatprep.subr.bf16.mxu0 %v3534_v15  ;;  %v3582_v15 = vcombine.high %v1280_v2, %v1284_v8  ;;  %v1070_v1 = vld [vmem:[#allocation8 + $0xf8] sm:$0xff] }
 0x3d3   :  { %2645 = vmatpush1.bf16.msra.mxu1 %v3531_v16  ;;  %v3579_v16 = vcombine.low %v1279_v0, %v1283_v54  ;;  %v1073_v0 = vld [vmem:[#allocation8 + $0x110] sm:$0xff] }
 0x3d4   :  { %2751 = vmatpush1.bf16.msra.mxu0 %v3533_v17  ;;  %2646 = vmatprep.subr.bf16.mxu1 %v3540_v20  ;;  %v3581_v17 = vcombine.low %v1280_v2, %v1284_v8  ;;  %v3588_v20 = vcombine.high %v1287_v31, %v1291_v32  ;;  %v1077_v54 = vld [vmem:[#allocation8 + $0x130] sm:$0xff]  ;;  %v1074_v2 = vld [vmem:[#allocation8 + $0x118] sm:$0xff] }
 0x3d5   :  { %2752 = vmatprep.subr.bf16.mxu0 %v3542_v21  ;;  %v3590_v21 = vcombine.high %v1288_v53, %v1292_v52  ;;  %v1078_v8 = vld [vmem:[#allocation8 + $0x138] sm:$0xff] }
 0x3d7   :  { %2647 = vmatpush1.bf16.msra.mxu1 %v3539_v26  ;;  %v3587_v26 = vcombine.low %v1287_v31, %v1291_v32  ;;  %v1081_v31 = vld [vmem:[#allocation8 + $0x150] sm:$0xff] }
 0x3d8   :  { %2753 = vmatpush1.bf16.msra.mxu0 %v3541_v27  ;;  %2648 = vmatprep.subr.bf16.mxu1 %v3548_v28  ;;  %v3589_v27 = vcombine.low %v1288_v53, %v1292_v52  ;;  %v3344_v28 = vcombine.high %v1041_v22, %v1045_v23  ;;  %v1085_v32 = vld [vmem:[#allocation8 + $0x170] sm:$0xff]  ;;  %v1082_v53 = vld [vmem:[#allocation8 + $0x158] sm:$0xff] }
 0x3d9   :  { %2754 = vmatprep.subr.bf16.mxu0 %v3550_v29  ;;  %v3346_v29 = vcombine.high %v1042_v24, %v1046_v25  ;;  %v1086_v52 = vld [vmem:[#allocation8 + $0x178] sm:$0xff] }
 0x3db   :  { %2649 = vmatpush1.bf16.msra.mxu1 %v3547_v35  ;;  %v3343_v35 = vcombine.low %v1041_v22, %v1045_v23  ;;  %v1093_v22 = vld [vmem:[#allocation8 + $0x1b0] sm:$0xff]  ;;  %v1090_v23 = vld [vmem:[#allocation8 + $0x198] sm:$0xff] }
 0x3dc   :  { %2755 = vmatpush1.bf16.msra.mxu0 %v3549_v36  ;;  %2650 = vmatprep.subr.bf16.mxu1 %v3556_v37  ;;  %v3345_v36 = vcombine.low %v1042_v24, %v1046_v25  ;;  %v3352_v37 = vcombine.high %v1049_v30, %v1053_v33  ;;  %v1094_v24 = vld [vmem:[#allocation8 + $0x1b8] sm:$0xff]  ;;  %v3383_v25 = vcombine.low %v1081_v31, %v1085_v32 }
 0x3dd   :  { %2756 = vmatprep.subr.bf16.mxu0 %v3558_v38  ;;  %v3354_v38 = vcombine.high %v1050_v3, %v1054_v34 }
 0x3df   :  { %2651 = vmatpush1.bf16.msra.mxu1 %v3555_v47  ;;  %v3351_v47 = vcombine.low %v1049_v30, %v1053_v33  ;;  %v1101_v30 = vld [vmem:[#allocation8 + $0x1f0] sm:$0xff]  ;;  %v1098_v33 = vld [vmem:[#allocation8 + $0x1d8] sm:$0xff] }
 0x3e0   :  { %2757 = vmatpush1.bf16.msra.mxu0 %v3557_v44  ;;  %2652 = vmatprep.subr.bf16.mxu1 %v3564_v45  ;;  %v3353_v44 = vcombine.low %v1050_v3, %v1054_v34  ;;  %v3360_v45 = vcombine.high %v1057_v39, %v1061_v9  ;;  %v1102_v3 = vld [vmem:[#allocation8 + $0x1f8] sm:$0xff] }
 0x3e1   :  { %2758 = vmatprep.subr.bf16.mxu0 %v3566_v49  ;;  %v3362_v49 = vcombine.high %v1058_v42, %v1062_v43 }
 0x3e3   :  { %2653 = vmatpush1.bf16.msra.mxu1 %v3563_v7  ;;  %v3359_v7 = vcombine.low %v1057_v39, %v1061_v9  ;;  %v1109_v39 = vld [vmem:[#allocation8 + $0x230] sm:$0xff]  ;;  %v1106_v9 = vld [vmem:[#allocation8 + $0x218] sm:$0xff] }
 0x3e4   :  { %2759 = vmatpush1.bf16.msra.mxu0 %v3565_v60  ;;  %2654 = vmatprep.subr.bf16.mxu1 %v3572_v61  ;;  %v3361_v60 = vcombine.low %v1058_v42, %v1062_v43  ;;  %v3368_v61 = vcombine.high %v1065_v4, %v1069_v46  ;;  %v1110_v42 = vld [vmem:[#allocation8 + $0x238] sm:$0xff] }
 0x3e5   :  { %2760 = vmatprep.subr.bf16.mxu0 %v3574_v50  ;;  %v3370_v50 = vcombine.high %v1066_v51, %v1070_v1 }
 0x3e7   :  { %2655 = vmatpush1.bf16.msra.mxu1 %v3571_v11  ;;  %v3367_v11 = vcombine.low %v1065_v4, %v1069_v46  ;;  %v1117_v4 = vld [vmem:[#allocation8 + $0x270] sm:$0xff]  ;;  %v1114_v46 = vld [vmem:[#allocation8 + $0x258] sm:$0xff] }
 0x3e8   :  { %2761 = vmatpush1.bf16.msra.mxu0 %v3573_v12  ;;  %2656 = vmatprep.subr.bf16.mxu1 %v3580_v5  ;;  %v3369_v12 = vcombine.low %v1066_v51, %v1070_v1  ;;  %v3376_v5 = vcombine.high %v1073_v0, %v1077_v54  ;;  %v1118_v51 = vld [vmem:[#allocation8 + $0x278] sm:$0xff] }
 0x3e9   :  { %2762 = vmatprep.subr.bf16.mxu0 %v3582_v15  ;;  %v3378_v15 = vcombine.high %v1074_v2, %v1078_v8 }
 0x3eb   :  { %2657 = vmatpush1.bf16.msra.mxu1 %v3579_v16  ;;  %v3375_v16 = vcombine.low %v1073_v0, %v1077_v54  ;;  %v1125_v0 = vld [vmem:[#allocation8 + $0x2b0] sm:$0xff]  ;;  %v1122_v54 = vld [vmem:[#allocation8 + $0x298] sm:$0xff] }
 0x3ec   :  { %2763 = vmatpush1.bf16.msra.mxu0 %v3581_v17  ;;  %2658 = vmatprep.subr.bf16.mxu1 %v3588_v20  ;;  %v3377_v17 = vcombine.low %v1074_v2, %v1078_v8  ;;  %v3384_v20 = vcombine.high %v1081_v31, %v1085_v32  ;;  %v1126_v2 = vld [vmem:[#allocation8 + $0x2b8] sm:$0xff]  ;;  %v1133_v31 = vld [vmem:[#allocation8 + $0x2f0] sm:$0xff] }
 0x3ed   :  { %2764 = vmatprep.subr.bf16.mxu0 %v3590_v21  ;;  %v3386_v21 = vcombine.high %v1082_v53, %v1086_v52  ;;  %v1130_v32 = vld [vmem:[#allocation8 + $0x2d8] sm:$0xff] }
 0x3ef   :  { %2659 = vmatpush1.bf16.msra.mxu1 %v3587_v26  ;;  %v3385_v26 = vcombine.low %v1082_v53, %v1086_v52  ;;  %v1134_v53 = vld [vmem:[#allocation8 + $0x2f8] sm:$0xff] }
 0x3f0   :  { %2765 = vmatpush1.bf16.msra.mxu0 %v3589_v27  ;;  %2787 = vmatprep.subr.bf16.mxu1 %v3344_v28  ;;  %v3394_v28 = vcombine.high %v1090_v23, %v1094_v24 }
 0x3f1   :  { %2893 = vmatprep.subr.bf16.mxu0 %v3346_v29  ;;  %v1097_v29 = vld [vmem:[#allocation8 + $0x1d0] sm:$0xff] }
 0x3f2   :  { %2661 = vmatmul.mubr.bf16.vlgmr.msra.gmra.mrb[8].mxu1 %v4351_v59  ;;  %v3399_v43 = vcombine.low %v1097_v29, %v1101_v30 }
 0x3f3   :  { %2767 = vmatmul.mubr.bf16.vlgmr.msra.gmra.mrb[16].mxu0 %v4351_v59  ;;  %2670 = vmatprep.mubr.bf16.mxu1 %v4426_v63 }
 0x3f4   :  { %2776 = vmatprep.mubr.bf16.mxu0 %v4426_v63  ;;  %2788 = vmatpush1.bf16.msra.mxu1 %v3343_v35  ;;  %v3393_v35 = vcombine.low %v1090_v23, %v1094_v24  ;;  %v1142_v23 = vld [vmem:[#allocation8 + $0x338] sm:$0xff] }
 0x3f5   :  { %2894 = vmatpush1.bf16.msra.mxu0 %v3345_v36  ;;  %2789 = vmatprep.subr.bf16.mxu1 %v3352_v37  ;;  %v3400_v36 = vcombine.high %v1097_v29, %v1101_v30  ;;  %v3402_v37 = vcombine.high %v1098_v33, %v1102_v3  ;;  %v1149_v29 = vld [vmem:[#allocation8 + $0x370] sm:$0xff]  ;;  %v1146_v30 = vld [vmem:[#allocation8 + $0x358] sm:$0xff] }
 0x3f6   :  { %2895 = vmatprep.subr.bf16.mxu0 %v3354_v38  ;;  %v1105_v38 = vld [vmem:[#allocation8 + $0x210] sm:$0xff] }
 0x3f7   :  { %v3407_v1 = vcombine.low %v1105_v38, %v1109_v39 }
 0x3f8   :  { %2790 = vmatpush1.bf16.msra.mxu1 %v3351_v47  ;;  %v3401_v47 = vcombine.low %v1098_v33, %v1102_v3  ;;  %v1150_v33 = vld [vmem:[#allocation8 + $0x378] sm:$0xff] }
 0x3f9   :  { %2896 = vmatpush1.bf16.msra.mxu0 %v3353_v44  ;;  %2791 = vmatprep.subr.bf16.mxu1 %v3360_v45  ;;  %v3408_v44 = vcombine.high %v1105_v38, %v1109_v39  ;;  %v3410_v45 = vcombine.high %v1106_v9, %v1110_v42  ;;  %v1157_v38 = vld [vmem:[#allocation8 + $0x3b0] sm:$0xff]  ;;  %v1154_v39 = vld [vmem:[#allocation8 + $0x398] sm:$0xff] }
 0x3fa   :  { %2671 = vmatmul.mubr.bf16.gmra.mrb[12].mxu1 %v4410_v6  ;;  %2897 = vmatprep.subr.bf16.mxu0 %v3362_v49  ;;  %v1113_v49 = vld [vmem:[#allocation8 + $0x250] sm:$0xff] }
 0x3fb   :  { %2777 = vmatmul.mubr.bf16.gmra.mrb[20].mxu0 %v4410_v6  ;;  %2819 = vmatprep.mubr.bf16.mxu1 %v4361_v13  ;;  %v3415_v8 = vcombine.low %v1113_v49, %v1117_v4 }
 0x3fc   :  { %2792 = vmatpush1.bf16.msra.mxu1 %v3359_v7  ;;  %2925 = vmatprep.mubr.bf16.mxu0 %v4361_v13  ;;  %v1089_v13 = vld [vmem:[#allocation8 + $0x190] sm:$0xff]  ;;  %v3409_v7 = vcombine.low %v1106_v9, %v1110_v42  ;;  %v1158_v9 = vld [vmem:[#allocation8 + $0x3b8] sm:$0xff] }
 0x3fd   :  { %2898 = vmatpush1.bf16.msra.mxu0 %v3361_v60  ;;  %2793 = vmatprep.subr.bf16.mxu1 %v3368_v61  ;;  %v3392_v27 = vcombine.high %v1089_v13, %v1093_v22  ;;  %v3391_v34 = vcombine.low %v1089_v13, %v1093_v22  ;;  %v3416_v60 = vcombine.high %v1113_v49, %v1117_v4  ;;  %v1141_v13 = vld [vmem:[#allocation8 + $0x330] sm:$0xff]  ;;  %v1138_v22 = vld [vmem:[#allocation8 + $0x318] sm:$0xff] }
 0x3fe   :  { %2899 = vmatprep.subr.bf16.mxu0 %v3370_v50  ;;  %v3418_v61 = vcombine.high %v1114_v46, %v1118_v51  ;;  %v1121_v50 = vld [vmem:[#allocation8 + $0x290] sm:$0xff]  ;;  %v1162_v4 = vld [vmem:[#allocation8 + $0x3d8] sm:$0xff] }
 0x3ff   :  { %v3423_v52 = vcombine.low %v1121_v50, %v1125_v0  ;;  %v1165_v49 = vld [vmem:[#allocation8 + $0x3f0] sm:$0xff] }
 0x400   :  { %2794 = vmatpush1.bf16.msra.mxu1 %v3367_v11  ;;  %v3417_v11 = vcombine.low %v1114_v46, %v1118_v51  ;;  %v1166_v46 = vld [vmem:[#allocation8 + $0x3f8] sm:$0xff] }
 0x401   :  { %2900 = vmatpush1.bf16.msra.mxu0 %v3369_v12  ;;  %2795 = vmatprep.subr.bf16.mxu1 %v3376_v5  ;;  %v3424_v12 = vcombine.high %v1121_v50, %v1125_v0  ;;  %v3426_v5 = vcombine.high %v1122_v54, %v1126_v2  ;;  %v1173_v50 = vld [vmem:[#allocation8 + $0x430] sm:$0xff]  ;;  %v1170_v0 = vld [vmem:[#allocation8 + $0x418] sm:$0xff] }
 0x402   :  { %2901 = vmatprep.subr.bf16.mxu0 %v3378_v15  ;;  %v1129_v15 = vld [vmem:[#allocation8 + $0x2d0] sm:$0xff] }
 0x403   :  { %v3431_v24 = vcombine.low %v1129_v15, %v1133_v31 }
 0x404   :  { %2796 = vmatpush1.bf16.msra.mxu1 %v3375_v16  ;;  %v3425_v16 = vcombine.low %v1122_v54, %v1126_v2  ;;  %v1174_v54 = vld [vmem:[#allocation8 + $0x438] sm:$0xff] }
 0x405   :  { %2902 = vmatpush1.bf16.msra.mxu0 %v3377_v17  ;;  %2797 = vmatprep.subr.bf16.mxu1 %v3384_v20  ;;  %v3432_v17 = vcombine.high %v1129_v15, %v1133_v31  ;;  %v3434_v20 = vcombine.high %v1130_v32, %v1134_v53  ;;  %v1181_v15 = vld [vmem:[#allocation8 + $0x470] sm:$0xff]  ;;  %v1178_v31 = vld [vmem:[#allocation8 + $0x458] sm:$0xff] }
 0x406   :  { %2903 = vmatprep.subr.bf16.mxu0 %v3386_v21  ;;  %v1137_v21 = vld [vmem:[#allocation8 + $0x310] sm:$0xff] }
 0x407   :  { %v3439_v3 = vcombine.low %v1137_v21, %v1141_v13 }
 0x408   :  { %2798 = vmatpush1.bf16.msra.mxu1 %v3383_v25  ;;  %v3433_v25 = vcombine.low %v1130_v32, %v1134_v53  ;;  %v1182_v32 = vld [vmem:[#allocation8 + $0x478] sm:$0xff] }
 0x409   :  { %2904 = vmatpush1.bf16.msra.mxu0 %v3385_v26  ;;  %2799 = vmatprep.subr.bf16.mxu1 %v3392_v27  ;;  %v3440_v26 = vcombine.high %v1137_v21, %v1141_v13  ;;  %v3442_v27 = vcombine.high %v1138_v22, %v1142_v23  ;;  %v1189_v21 = vld [vmem:[#allocation8 + $0x4b0] sm:$0xff]  ;;  %v1186_v13 = vld [vmem:[#allocation8 + $0x498] sm:$0xff] }
 0x40a   :  { %2905 = vmatprep.subr.bf16.mxu0 %v3394_v28  ;;  %v1145_v28 = vld [vmem:[#allocation8 + $0x350] sm:$0xff] }
 0x40b   :  { %v3447_v42 = vcombine.low %v1145_v28, %v1149_v29 }
 0x40c   :  { %2800 = vmatpush1.bf16.msra.mxu1 %v3391_v34  ;;  %v3441_v34 = vcombine.low %v1138_v22, %v1142_v23  ;;  %v1190_v22 = vld [vmem:[#allocation8 + $0x4b8] sm:$0xff] }
 0x40d   :  { %2906 = vmatpush1.bf16.msra.mxu0 %v3393_v35  ;;  %2801 = vmatprep.subr.bf16.mxu1 %v3400_v36  ;;  %v3448_v35 = vcombine.high %v1145_v28, %v1149_v29  ;;  %v3450_v36 = vcombine.high %v1146_v30, %v1150_v33  ;;  %v1197_v28 = vld [vmem:[#allocation8 + $0x4f0] sm:$0xff]  ;;  %v1194_v29 = vld [vmem:[#allocation8 + $0x4d8] sm:$0xff] }
 0x40e   :  { %2907 = vmatprep.subr.bf16.mxu0 %v3402_v37  ;;  %v1153_v37 = vld [vmem:[#allocation8 + $0x390] sm:$0xff] }
 0x40f   :  { %v3455_v51 = vcombine.low %v1153_v37, %v1157_v38 }
 0x410   :  { %2802 = vmatpush1.bf16.msra.mxu1 %v3399_v43  ;;  %v3449_v43 = vcombine.low %v1146_v30, %v1150_v33  ;;  %v1198_v30 = vld [vmem:[#allocation8 + $0x4f8] sm:$0xff]  ;;  %v3489_v33 = vcombine.low %v1186_v13, %v1190_v22 }
 0x411   :  { %2908 = vmatpush1.bf16.msra.mxu0 %v3401_v47  ;;  %2803 = vmatprep.subr.bf16.mxu1 %v3408_v44  ;;  %v3456_v47 = vcombine.high %v1153_v37, %v1157_v38  ;;  %v3458_v44 = vcombine.high %v1154_v39, %v1158_v9  ;;  %v1206_v37 = vld [vmem:[#allocation8 + $0x538] sm:$0xff] }
 0x412   :  { %2909 = vmatprep.subr.bf16.mxu0 %v3410_v45  ;;  %v1161_v45 = vld [vmem:[#allocation8 + $0x3d0] sm:$0xff] }
 0x413   :  { %v3463_v2 = vcombine.low %v1161_v45, %v1165_v49 }
 0x414   :  { %2804 = vmatpush1.bf16.msra.mxu1 %v3407_v1  ;;  %v3457_v1 = vcombine.low %v1154_v39, %v1158_v9  ;;  %v3497_v39 = vcombine.low %v1194_v29, %v1198_v30 }
 0x415   :  { %2910 = vmatpush1.bf16.msra.mxu0 %v3409_v7  ;;  %2805 = vmatprep.subr.bf16.mxu1 %v3416_v60  ;;  %v3464_v7 = vcombine.high %v1161_v45, %v1165_v49  ;;  %v3466_v60 = vcombine.high %v1162_v4, %v1166_v46  ;;  %v1214_v45 = vld [vmem:[#allocation8 + $0x578] sm:$0xff] }
 0x416   :  { %2911 = vmatprep.subr.bf16.mxu0 %v3418_v61  ;;  %v1169_v61 = vld [vmem:[#allocation8 + $0x410] sm:$0xff] }
 0x417   :  { %v3471_v53 = vcombine.low %v1169_v61, %v1173_v50 }
 0x418   :  { %2806 = vmatpush1.bf16.msra.mxu1 %v3415_v8  ;;  %v3465_v8 = vcombine.low %v1162_v4, %v1166_v46 }
 0x419   :  { %2912 = vmatpush1.bf16.msra.mxu0 %v3417_v11  ;;  %2807 = vmatprep.subr.bf16.mxu1 %v3424_v12  ;;  %v3472_v11 = vcombine.high %v1169_v61, %v1173_v50  ;;  %v3474_v12 = vcombine.high %v1170_v0, %v1174_v54 }
 0x41a   :  { %2913 = vmatprep.subr.bf16.mxu0 %v3426_v5  ;;  %v1177_v5 = vld [vmem:[#allocation8 + $0x450] sm:$0xff] }
 0x41b   :  { %v3479_v23 = vcombine.low %v1177_v5, %v1181_v15 }
 0x41c   :  { %2808 = vmatpush1.bf16.msra.mxu1 %v3423_v52  ;;  %v3473_v52 = vcombine.low %v1170_v0, %v1174_v54  ;;  %v1225_v54 = vld [vmem:[#allocation8 + $0x5d0] sm:$0xff] }
 0x41d   :  { %2914 = vmatpush1.bf16.msra.mxu0 %v3425_v16  ;;  %2809 = vmatprep.subr.bf16.mxu1 %v3432_v17  ;;  %v3480_v16 = vcombine.high %v1177_v5, %v1181_v15  ;;  %v3482_v17 = vcombine.high %v1178_v31, %v1182_v32 }
 0x41e   :  { %2915 = vmatprep.subr.bf16.mxu0 %v3434_v20  ;;  %v1185_v20 = vld [vmem:[#allocation8 + $0x490] sm:$0xff] }
 0x420   :  { %2810 = vmatpush1.bf16.msra.mxu1 %v3431_v24  ;;  %v3481_v24 = vcombine.low %v1178_v31, %v1182_v32  ;;  %v1233_v32 = vld [vmem:[#allocation8 + $0x610] sm:$0xff] }
 0x421   :  { %2916 = vmatpush1.bf16.msra.mxu0 %v3433_v25  ;;  %2811 = vmatprep.subr.bf16.mxu1 %v3440_v26  ;;  %v3488_v25 = vcombine.high %v1185_v20, %v1189_v21  ;;  %v3490_v26 = vcombine.high %v1186_v13, %v1190_v22  ;;  %v1241_v22 = vld [vmem:[#allocation8 + $0x650] sm:$0xff] }
 0x422   :  { %2917 = vmatprep.subr.bf16.mxu0 %v3442_v27  ;;  %v1193_v27 = vld [vmem:[#allocation8 + $0x4d0] sm:$0xff] }
 0x423   :  { %v3495_v38 = vcombine.low %v1193_v27, %v1197_v28 }
 0x424   :  { %2812 = vmatpush1.bf16.msra.mxu1 %v3439_v3  ;;  %v3496_v3 = vcombine.high %v1193_v27, %v1197_v28 }
 0x425   :  { %2918 = vmatpush1.bf16.msra.mxu0 %v3441_v34  ;;  %2813 = vmatprep.subr.bf16.mxu1 %v3448_v35  ;;  %v1201_v34 = vld [vmem:[#allocation8 + $0x510] sm:$0xff] }
 0x426   :  { %2919 = vmatprep.subr.bf16.mxu0 %v3450_v36  ;;  %v1205_v35 = vld [vmem:[#allocation8 + $0x530] sm:$0xff]  ;;  %v1202_v36 = vld [vmem:[#allocation8 + $0x518] sm:$0xff] }
 0x427   :  { %v3504_v9 = vcombine.high %v1201_v34, %v1205_v35  ;;  %v3505_v49 = vcombine.low %v1202_v36, %v1206_v37 }
 0x428   :  { %2814 = vmatpush1.bf16.msra.mxu1 %v3447_v42  ;;  %v3506_v42 = vcombine.high %v1202_v36, %v1206_v37  ;;  %v1257_v37 = vld [vmem:[#allocation8 + $0x6d0] sm:$0xff] }
 0x429   :  { %2920 = vmatpush1.bf16.msra.mxu0 %v3449_v43  ;;  %2815 = vmatprep.subr.bf16.mxu1 %v3456_v47  ;;  %v1209_v43 = vld [vmem:[#allocation8 + $0x550] sm:$0xff] }
 0x42a   :  { %2921 = vmatprep.subr.bf16.mxu0 %v3458_v44  ;;  %v1213_v47 = vld [vmem:[#allocation8 + $0x570] sm:$0xff]  ;;  %v1210_v44 = vld [vmem:[#allocation8 + $0x558] sm:$0xff] }
 0x42b   :  { %v3512_v4 = vcombine.high %v1209_v43, %v1213_v47  ;;  %v3514_v46 = vcombine.high %v1210_v44, %v1214_v45  ;;  %v3513_v61 = vcombine.low %v1210_v44, %v1214_v45  ;;  %v1265_v45 = vld [vmem:[#allocation8 + $0x710] sm:$0xff] }
 0x42c   :  { %2816 = vmatpush1.bf16.msra.mxu1 %v3455_v51  ;;  %v1221_v51 = vld [vmem:[#allocation8 + $0x5b0] sm:$0xff] }
 0x42d   :  { %2922 = vmatpush1.bf16.msra.mxu0 %v3457_v1  ;;  %2817 = vmatprep.subr.bf16.mxu1 %v3464_v7  ;;  %v1218_v1 = vld [vmem:[#allocation8 + $0x598] sm:$0xff] }
 0x42e   :  { %2923 = vmatprep.subr.bf16.mxu0 %v3466_v60  ;;  %v1222_v7 = vld [vmem:[#allocation8 + $0x5b8] sm:$0xff]  ;;  %v3511_v60 = vcombine.low %v1209_v43, %v1213_v47 }
 0x42f   :  { %v3522_v0 = vcombine.high %v1218_v1, %v1222_v7  ;;  %v3521_v5 = vcombine.low %v1218_v1, %v1222_v7  ;;  %v1273_v7 = vld [vmem:[#allocation8 + $0x750] sm:$0xff] }
 0x430   :  { %2818 = vmatpush1.bf16.msra.mxu1 %v3463_v2  ;;  %v1229_v2 = vld [vmem:[#allocation8 + $0x5f0] sm:$0xff] }
 0x431   :  { %2924 = vmatpush1.bf16.msra.mxu0 %v3465_v8  ;;  %2840 = vmatprep.subr.bf16.mxu1 %v3472_v11  ;;  %v1226_v8 = vld [vmem:[#allocation8 + $0x5d8] sm:$0xff]  ;;  %v3528_v15 = vcombine.high %v1225_v54, %v1229_v2 }
 0x432   :  { %2946 = vmatprep.subr.bf16.mxu0 %v3474_v12  ;;  %v1230_v11 = vld [vmem:[#allocation8 + $0x5f8] sm:$0xff] }
 0x433   :  { %2820 = vmatmul.mubr.bf16.vlgmr.msra.gmra.mrb[16].mxu1 %v4349_v56  ;;  %v3530_v31 = vcombine.high %v1226_v8, %v1230_v11 }
 0x434   :  { %2926 = vmatmul.mubr.bf16.vlgmr.msra.gmra.mrb[24].mxu0 %v4349_v56  ;;  %2829 = vmatprep.mubr.bf16.mxu1 %v4412_v40  ;;  %v3487_v56 = vcombine.low %v1185_v20, %v1189_v21  ;;  %v3529_v20 = vcombine.low %v1226_v8, %v1230_v11  ;;  %v1281_v11 = vld [vmem:[#allocation8 + $0x790] sm:$0xff] }
 0x435   :  { %2841 = vmatpush1.bf16.msra.mxu1 %v3471_v53  ;;  %2935 = vmatprep.mubr.bf16.mxu0 %v4412_v40  ;;  %v3498_v40 = vcombine.high %v1194_v29, %v1198_v30  ;;  %v1237_v53 = vld [vmem:[#allocation8 + $0x630] sm:$0xff] }
 0x436   :  { %2947 = vmatpush1.bf16.msra.mxu0 %v3473_v52  ;;  %2842 = vmatprep.subr.bf16.mxu1 %v3480_v16  ;;  %v1234_v52 = vld [vmem:[#allocation8 + $0x618] sm:$0xff]  ;;  %v3536_v21 = vcombine.high %v1233_v32, %v1237_v53  ;;  %v1249_v30 = vld [vmem:[#allocation8 + $0x690] sm:$0xff] }
 0x437   :  { %2948 = vmatprep.subr.bf16.mxu0 %v3482_v17  ;;  %v1238_v16 = vld [vmem:[#allocation8 + $0x638] sm:$0xff]  ;;  %v3527_v17 = vcombine.low %v1225_v54, %v1229_v2 }
 0x438   :  { %v3538_v13 = vcombine.high %v1234_v52, %v1238_v16  ;;  %v3537_v27 = vcombine.low %v1234_v52, %v1238_v16  ;;  %v1289_v16 = vld [vmem:[#allocation8 + $0x7d0] sm:$0xff] }
 0x439   :  { %2843 = vmatpush1.bf16.msra.mxu1 %v3479_v23  ;;  %v1245_v23 = vld [vmem:[#allocation8 + $0x670] sm:$0xff] }
 0x43a   :  { %2949 = vmatpush1.bf16.msra.mxu0 %v3481_v24  ;;  %2844 = vmatprep.subr.bf16.mxu1 %v3488_v25  ;;  %v1242_v24 = vld [vmem:[#allocation8 + $0x658] sm:$0xff]  ;;  %v3544_v28 = vcombine.high %v1241_v22, %v1245_v23 }
 0x43b   :  { %2830 = vmatmul.mubr.bf16.gmra.mrb[20].mxu1 %v4406_v48  ;;  %2950 = vmatprep.subr.bf16.mxu0 %v3490_v26  ;;  %v1246_v25 = vld [vmem:[#allocation8 + $0x678] sm:$0xff]  ;;  %v3535_v26 = vcombine.low %v1233_v32, %v1237_v53 }
 0x43c   :  { %2936 = vmatmul.mubr.bf16.gmra.mrb[28].mxu0 %v4406_v48  ;;  %2872 = vmatprep.mubr.bf16.mxu1 %v4368_v19  ;;  %v3503_v48 = vcombine.low %v1201_v34, %v1205_v35  ;;  %v3546_v29 = vcombine.high %v1242_v24, %v1246_v25  ;;  %v3545_v34 = vcombine.low %v1242_v24, %v1246_v25 }
 0x43d   :  { %2845 = vmatpush1.bf16.msra.mxu1 %v3487_v56  ;;  %2978 = vmatprep.mubr.bf16.mxu0 %v4368_v19  ;;  %v1217_v19 = vld [vmem:[#allocation8 + $0x590] sm:$0xff] }
 0x43e   :  { %2951 = vmatpush1.bf16.msra.mxu0 %v3489_v33  ;;  %2846 = vmatprep.subr.bf16.mxu1 %v3496_v3  ;;  %v3520_v50 = vcombine.high %v1217_v19, %v1221_v51  ;;  %v3519_v12 = vcombine.low %v1217_v19, %v1221_v51  ;;  %v1253_v56 = vld [vmem:[#allocation8 + $0x6b0] sm:$0xff]  ;;  %v1250_v33 = vld [vmem:[#allocation8 + $0x698] sm:$0xff] }
 0x43f   :  { %2952 = vmatprep.subr.bf16.mxu0 %v3498_v40  ;;  %v1254_v3 = vld [vmem:[#allocation8 + $0x6b8] sm:$0xff]  ;;  %v3543_v40 = vcombine.low %v1241_v22, %v1245_v23  ;;  %v3552_v35 = vcombine.high %v1249_v30, %v1253_v56 }
 0x440   :  { %v3554_v36 = vcombine.high %v1250_v33, %v1254_v3  ;;  %v3553_v43 = vcombine.low %v1250_v33, %v1254_v3 }
 0x441   :  { %2847 = vmatpush1.bf16.msra.mxu1 %v3495_v38  ;;  %v1261_v38 = vld [vmem:[#allocation8 + $0x6f0] sm:$0xff] }
 0x442   :  { %2953 = vmatpush1.bf16.msra.mxu0 %v3497_v39  ;;  %2848 = vmatprep.subr.bf16.mxu1 %v3504_v9  ;;  %v1258_v39 = vld [vmem:[#allocation8 + $0x6d8] sm:$0xff]  ;;  %v3560_v47 = vcombine.high %v1257_v37, %v1261_v38 }
 0x443   :  { %2954 = vmatprep.subr.bf16.mxu0 %v3506_v42  ;;  %v1262_v9 = vld [vmem:[#allocation8 + $0x6f8] sm:$0xff]  ;;  %v3551_v42 = vcombine.low %v1249_v30, %v1253_v56  ;;  %v3844_v56 = vld [vmem:[#allocation10 + $0x8] sm:$0xff]  }
 0x444   :  { %v3562_v44 = vcombine.high %v1258_v39, %v1262_v9  ;;  %v3561_v19 = vcombine.low %v1258_v39, %v1262_v9 }
 0x445   :  { %2849 = vmatpush1.bf16.msra.mxu1 %v3503_v48  ;;  %v1269_v48 = vld [vmem:[#allocation8 + $0x730] sm:$0xff] }
 0x446   :  { %2955 = vmatpush1.bf16.msra.mxu0 %v3505_v49  ;;  %2850 = vmatprep.subr.bf16.mxu1 %v3512_v4  ;;  %v1266_v49 = vld [vmem:[#allocation8 + $0x718] sm:$0xff]  ;;  %v3568_v51 = vcombine.high %v1265_v45, %v1269_v48 }
 0x447   :  { %2956 = vmatprep.subr.bf16.mxu0 %v3514_v46  ;;  %v1270_v4 = vld [vmem:[#allocation8 + $0x738] sm:$0xff]  ;;  %v3559_v46 = vcombine.low %v1257_v37, %v1261_v38 }
 0x448   :  { %v3570_v1 = vcombine.high %v1266_v49, %v1270_v4  ;;  %v3569_v54 = vcombine.low %v1266_v49, %v1270_v4  ;;  %v3850_v38 = vld [vmem:[#allocation10 + $0x38] sm:$0xff]  }
 0x449   :  { %2851 = vmatpush1.bf16.msra.mxu1 %v3511_v60  ;;  %v1277_v60 = vld [vmem:[#allocation8 + $0x770] sm:$0xff] }
 0x44a   :  { %2957 = vmatpush1.bf16.msra.mxu0 %v3513_v61  ;;  %2852 = vmatprep.subr.bf16.mxu1 %v3520_v50  ;;  %v1274_v61 = vld [vmem:[#allocation8 + $0x758] sm:$0xff]  ;;  %v3576_v2 = vcombine.high %v1273_v7, %v1277_v60 }
 0x44b   :  { %2958 = vmatprep.subr.bf16.mxu0 %v3522_v0  ;;  %v1278_v50 = vld [vmem:[#allocation8 + $0x778] sm:$0xff]  ;;  %v3567_v0 = vcombine.low %v1265_v45, %v1269_v48 }
 0x44c   :  { %v3578_v8 = vcombine.high %v1274_v61, %v1278_v50  ;;  %v3577_v32 = vcombine.low %v1274_v61, %v1278_v50 }
 0x44d   :  { %2853 = vmatpush1.bf16.msra.mxu1 %v3519_v12  ;;  %v1285_v12 = vld [vmem:[#allocation8 + $0x7b0] sm:$0xff] }
 0x44e   :  { %2959 = vmatpush1.bf16.msra.mxu0 %v3521_v5  ;;  %2854 = vmatprep.subr.bf16.mxu1 %v3528_v15  ;;  %v1282_v5 = vld [vmem:[#allocation8 + $0x798] sm:$0xff]  ;;  %v3584_v53 = vcombine.high %v1281_v11, %v1285_v12 }
 0x44f   :  { %2960 = vmatprep.subr.bf16.mxu0 %v3530_v31  ;;  %v1286_v15 = vld [vmem:[#allocation8 + $0x7b8] sm:$0xff]  ;;  %v3575_v31 = vcombine.low %v1273_v7, %v1277_v60 }
 0x450   :  { %v3586_v52 = vcombine.high %v1282_v5, %v1286_v15  ;;  %v3585_v22 = vcombine.low %v1282_v5, %v1286_v15 }
 0x451   :  { %2855 = vmatpush1.bf16.msra.mxu1 %v3527_v17  ;;  %v1293_v17 = vld [vmem:[#allocation8 + $0x7f0] sm:$0xff] }
 0x452   :  { %2961 = vmatpush1.bf16.msra.mxu0 %v3529_v20  ;;  %2856 = vmatprep.subr.bf16.mxu1 %v3536_v21  ;;  %v1290_v20 = vld [vmem:[#allocation8 + $0x7d8] sm:$0xff]  ;;  %v3592_v23 = vcombine.high %v1289_v16, %v1293_v17  ;;  %v3591_v25 = vcombine.low %v1289_v16, %v1293_v17 }
 0x453   :  { %2962 = vmatprep.subr.bf16.mxu0 %v3538_v13  ;;  %v1294_v21 = vld [vmem:[#allocation8 + $0x7f8] sm:$0xff]  ;;  %v3583_v13 = vcombine.low %v1281_v11, %v1285_v12 }
 0x454   :  { %v3594_v24 = vcombine.high %v1290_v20, %v1294_v21 }
 0x455   :  { %2857 = vmatpush1.bf16.msra.mxu1 %v3535_v26  ;;  %v3593_v26 = vcombine.low %v1290_v20, %v1294_v21 }
 0x456   :  { %2963 = vmatpush1.bf16.msra.mxu0 %v3537_v27  ;;  %2858 = vmatprep.subr.bf16.mxu1 %v3544_v28  ;;  %v3843_v27 = vld [vmem:[#allocation10] sm:$0xff]   ;;  %v3731_v28 = vpop.permute.xlu0 %3730 }
 0x457   :  { %2964 = vmatprep.subr.bf16.mxu0 %v3546_v29  ;;  %v3733_v29 = vunpack.i.h.bf16 %v3731_v28  ;;  %v3732_v30 = vunpack.i.l.bf16 %v3731_v28 }
 0x459   :  { %2859 = vmatpush1.bf16.msra.mxu1 %v3543_v40  ;;  %v1034_v33 = vmax.f32 %v4400_v57, %v3733_v29  ;;  %v1033_v3 = vmax.f32 %v4359_v10, %v3732_v30  ;;  %v3845_v40 = vld [vmem:[#allocation10 + $0x10] sm:$0xff]   ;;  %v3736_v57 = vpop.permute.xlu1 %3735 }
 0x45a   :  { %2965 = vmatpush1.bf16.msra.mxu0 %v3545_v34  ;;  %2860 = vmatprep.subr.bf16.mxu1 %v3552_v35  ;;  %v3846_v35 = vld [vmem:[#allocation10 + $0x18] sm:$0xff]   ;;  %v3849_v10 = vld [vmem:[#allocation10 + $0x30] sm:$0xff]   ;;  %v3737_v37 = vunpack.i.l.bf16 %v3736_v57  ;;  %v3009_v61 = vpop.permute.xlu0 %3008 }
 0x45b   :  { %2966 = vmatprep.subr.bf16.mxu0 %v3554_v36  ;;  %v1037_v34 = vpack.c.bf16 %v1034_v33, %v1033_v3  ;;  %v3738_v36 = vunpack.i.h.bf16 %v3736_v57  ;;  %vm3019_vm1 = vcmp.lt.s32.totalorder %v4259_v55, %v3009_v61  ;;  %vm3021_vm2 = vcmp.lt.s32.totalorder %v4262_v58, %v3009_v61 }
 0x45c   :  { %vm3020_vm3 = vcmp.lt.s32.totalorder %v4268_v62, %v3009_v61  ;;  %vm3022_vm4 = vcmp.lt.s32.totalorder %v4271_v41, %v3009_v61 }
 0x45d   :  { %2861 = vmatpush1.bf16.msra.mxu1 %v3551_v42  ;;  %v1036_v39 = vmax.f32 %v4432_v18, %v3738_v36  ;;  %v4490_v50 = vpop.permute.xlu1 %3011 }
 0x45e   :  { %2967 = vmatpush1.bf16.msra.mxu0 %v3553_v43  ;;  %2862 = vmatprep.subr.bf16.mxu1 %v3560_v47  ;;  %v4504_v11 = vpop.permute.xlu0 %3014  ;;  %vm3027_vm6 = vcmp.lt.s32.totalorder %v4259_v55, %v4490_v50  ;;  %vm3029_vm10 = vcmp.lt.s32.totalorder %v4262_v58, %v4490_v50  ;;  %vm3028_vm11 = vcmp.lt.s32.totalorder %v4268_v62, %v4490_v50 }
 0x45f   :  { %2968 = vmatprep.subr.bf16.mxu0 %v3562_v44  ;;  %vm3030_vm12 = vcmp.lt.s32.totalorder %v4271_v41, %v4490_v50 }
 0x461   :  { %2863 = vmatpush1.bf16.msra.mxu1 %v3559_v46  ;;  %v4507_v12 = vpop.permute.xlu1 %3017 }
 0x462   :  { %2969 = vmatpush1.bf16.msra.mxu0 %v3561_v19  ;;  %2864 = vmatprep.subr.bf16.mxu1 %v3568_v51  ;;  %vm3045_vm8 = vcmp.lt.s32.totalorder %v4262_v58, %v4507_v12  ;;  %vm3044_vm9 = vcmp.lt.s32.totalorder %v4268_v62, %v4507_v12  ;;  %vm3046_vm15 = vcmp.lt.s32.totalorder %v4271_v41, %v4507_v12 }
 0x463   :  { %2970 = vmatprep.subr.bf16.mxu0 %v3570_v1 }
 0x465   :  { %2865 = vmatpush1.bf16.msra.mxu1 %v3567_v0  ;;  %v4493_v0 = vadd.s32 512, %v4259_v55 }
 0x466   :  { %2971 = vmatpush1.bf16.msra.mxu0 %v3569_v54  ;;  %2866 = vmatprep.subr.bf16.mxu1 %v3576_v2  ;;  %v4496_v54 = vadd.s32 768, %v4259_v55  ;;  %v4499_v2 = vadd.s32 640, %v4259_v55 }
 0x467   :  { %2972 = vmatprep.subr.bf16.mxu0 %v3578_v8  ;;  %v4502_v8 = vadd.s32 896, %v4259_v55  ;;  %vm3023_vm5 = vcmp.lt.s32.totalorder %v4493_v0, %v3009_v61  ;;  %vm3031_vm0 = vcmp.lt.s32.totalorder %v4493_v0, %v4490_v50 }
 0x468   :  { %vm3033_vm7 = vcmp.lt.s32.totalorder %v4496_v54, %v4490_v50  ;;  %vm3032_vm13 = vcmp.lt.s32.totalorder %v4499_v2, %v4490_v50 }
 0x469   :  { %2867 = vmatpush1.bf16.msra.mxu1 %v3575_v31  ;;  %vm3034_vm14 = vcmp.lt.s32.totalorder %v4502_v8, %v4490_v50 }
 0x46a   :  { %2973 = vmatpush1.bf16.msra.mxu0 %v3577_v32  ;;  %2868 = vmatprep.subr.bf16.mxu1 %v3584_v53 }
 0x46b   :  { %2974 = vmatprep.subr.bf16.mxu0 %v3586_v52 }
 0x46d   :  { %2869 = vmatpush1.bf16.msra.mxu1 %v3583_v13 }
 0x46e   :  { %2975 = vmatpush1.bf16.msra.mxu0 %v3585_v22  ;;  %2870 = vmatprep.subr.bf16.mxu1 %v3592_v23 }
 0x46f   :  { %2976 = vmatprep.subr.bf16.mxu0 %v3594_v24 }
 0x471   :  { %2871 = vmatpush1.bf16.msra.mxu1 %v3591_v25 }
 0x472   :  { %2977 = vmatpush1.bf16.msra.mxu0 %v3593_v26  ;;  %3614 = vmatprep.subr.bf16.mxu1 %v3843_v27 }
 0x474   :  { %2873 = vmatmul.mubr.bf16.vlgmr.msra.gmra.mrb[16].mxu1 %v4351_v59 }
 0x475   :  { %2979 = vmatmul.mubr.bf16.vlgmr.msra.gmra.mrb[24].mxu0 %v4351_v59  ;;  %2882 = vmatprep.mubr.bf16.mxu1 %v4426_v63  ;;  %v3847_v59 = vld [vmem:[#allocation10 + $0x20] sm:$0xff]  }
 0x476   :  { %2988 = vmatprep.mubr.bf16.mxu0 %v4426_v63  ;;  %3615 = vmatpush3.bf16.msra.mxu1 %v3843_v27  ;;  %v3848_v63 = vld [vmem:[#allocation10 + $0x28] sm:$0xff]  }
 0x477   :  { %3616 = vmatprep.subr.bf16.mxu1 %v3844_v56 }
 0x47a   :  { %3617 = vmatpush3.bf16.msra.mxu1 %v3844_v56 }
 0x47b   :  { %3618 = vmatprep.subr.bf16.mxu1 %v3845_v40 }
 0x47c   :  { %2883 = vmatmul.mubr.bf16.gmra.mrb[20].mxu1 %v4410_v6 }
 0x47d   :  { %2989 = vmatmul.mubr.bf16.gmra.mrb[28].mxu0 %v4410_v6  ;;  %3630 = vmatprep.mubr.bf16.mxu1 %v1037_v34  ;;  %v1035_v6 = vmax.f32 %v4424_v14, %v3737_v37 }
 0x47e   :  { %3619 = vmatpush3.bf16.msra.mxu1 %v3845_v40 }
 0x47f   :  { %3620 = vmatprep.subr.bf16.mxu1 %v3846_v35  ;;  %v1038_v9 = vpack.c.bf16 %v1036_v39, %v1035_v6 }
 0x482   :  { %3621 = vmatpush3.bf16.msra.mxu1 %v3846_v35 }
 0x483   :  { %3622 = vmatprep.subr.bf16.mxu1 %v3847_v59 }
 0x486   :  { %3623 = vmatpush3.bf16.msra.mxu1 %v3847_v59 }
 0x487   :  { %3624 = vmatprep.subr.bf16.mxu1 %v3848_v63 }
 0x48a   :  { %3625 = vmatpush3.bf16.msra.mxu1 %v3848_v63 }
 0x48b   :  { %3626 = vmatprep.subr.bf16.mxu1 %v3849_v10 }
 0x48e   :  { %3627 = vmatpush3.bf16.msra.mxu1 %v3849_v10 }
 0x48f   :  { %3628 = vmatprep.subr.bf16.mxu1 %v3850_v38 }
 0x492   :  { %3629 = vmatpush3.bf16.msra.mxu1 %v3850_v38 }
 0x495   :  { %3631 = vmatmul.mubr.bf16.vlgmr.msra.gmra.mrb[24].mxu1 %v1038_v9 }
 0x4c5   :  { %v2662_v42 = vpop.f32.mrb[8].mxu1 }
 0x4c6   :  { %v2768_v43 = vpop.f32.mrb[16].mxu0  ;;  %v2664_v47 = vpop.f32.mrb[9].mxu1  ;;  %v3051_v5 = vsel %vm3019_vm1, %v2662_v42, -inf  ;;  %vm3039_vm1 = vcmp.lt.s32.totalorder %v4493_v0, %v4504_v11 }
 0x4c7   :  { %v2770_v44 = vpop.f32.mrb[17].mxu0  ;;  %v2666_v45 = vpop.f32.mrb[10].mxu1  ;;  %v3053_v15 = vsel %vm3021_vm2, %v2768_v43, -inf  ;;  %v3052_v31 = vsel %vm3020_vm3, %v2664_v47, -inf  ;;  %vm3041_vm2 = vcmp.lt.s32.totalorder %v4496_v54, %v4504_v11  ;;  %vm3040_vm3 = vcmp.lt.s32.totalorder %v4499_v2, %v4504_v11 }
 0x4c8   :  { %v2772_v48 = vpop.f32.mrb[18].mxu0  ;;  %v2668_v49 = vpop.f32.mrb[11].mxu1  ;;  %v3054_v32 = vsel %vm3022_vm4, %v2770_v44, -inf  ;;  %v3059_v52 = vsel %vm3027_vm6, %v2666_v45, -inf  ;;  %vm4686_vm4 = vcmp.lt.s32.totalorder %v4496_v54, %v3009_v61  ;;  %vm4687_vm6 = vcmp.lt.s32.totalorder %v4499_v2, %v3009_v61 }
 0x4c9   :  { %v2774_v4 = vpop.f32.mrb[19].mxu0  ;;  %v3061_v16 = vsel %vm3029_vm10, %v2772_v48, -inf  ;;  %v3060_v17 = vsel %vm3028_vm11, %v2668_v49, -inf  ;;  %vm3047_vm10 = vcmp.lt.s32.totalorder %v4493_v0, %v4507_v12  ;;  %vm4688_vm11 = vcmp.lt.s32.totalorder %v4502_v8, %v3009_v61 }
 0x4ca   :  { %v3062_v22 = vsel %vm3030_vm12, %v2774_v4, -inf  ;;  %vm3049_vm12 = vcmp.lt.s32.totalorder %v4496_v54, %v4507_v12 }
 0x4cd   :  { %v4474_v46 = vpop.f32.mrb[12].mxu1 }
 0x4ce   :  { %v4476_v19 = vpop.f32.mrb[20].mxu0  ;;  %v4478_v51 = vpop.f32.mrb[13].mxu1 }
 0x4cf   :  { %v4480_v18 = vpop.f32.mrb[21].mxu0  ;;  %v4482_v14 = vpop.f32.mrb[14].mxu1 }
 0x4d0   :  { %v4484_v1 = vpop.f32.mrb[22].mxu0  ;;  %v4486_v7 = vpop.f32.mrb[15].mxu1 }
 0x4d1   :  { %v4488_v60 = vpop.f32.mrb[23].mxu0  ;;  %v3077_v4 = vsel %vm3045_vm8, %v4484_v1, -inf }
 0x547   :  { %v2874_v53 = vpop.f32.mrb[16].mxu1 }
 0x548   :  { %v3055_v20 = vsel %vm3023_vm5, %v2874_v53, -inf  ;;  %v2980_v21 = vpop.f32.mrb[24].mxu0  ;;  %v2876_v13 = vpop.f32.mrb[17].mxu1  ;;  %vm3042_vm5 = vcmp.lt.s32.totalorder %v4502_v8, %v4504_v11 }
 0x549   :  { %v3083_v23 = vmax.f32 %v3051_v5, %v3055_v20  ;;  %v3057_v24 = vsel %vm4686_vm4, %v2980_v21, -inf  ;;  %v3056_v25 = vsel %vm4687_vm6, %v2876_v13, -inf  ;;  %v2982_v26 = vpop.f32.mrb[25].mxu0  ;;  %v2878_v27 = vpop.f32.mrb[18].mxu1  ;;  %vm4690_vm4 = vcmp.lt.s32.totalorder %v4262_v58, %v4504_v11 }
 0x54a   :  { %v3085_v28 = vmax.f32 %v3053_v15, %v3057_v24  ;;  %v3084_v29 = vmax.f32 %v3052_v31, %v3056_v25  ;;  %v3058_v30 = vsel %vm4688_vm11, %v2982_v26, -inf  ;;  %v3063_v56 = vsel %vm3031_vm0, %v2878_v27, -inf  ;;  %v2984_v33 = vpop.f32.mrb[26].mxu0  ;;  %v2880_v3 = vpop.f32.mrb[19].mxu1 }
 0x54b   :  { %v3086_v40 = vmax.f32 %v3054_v32, %v3058_v30  ;;  %v3087_v34 = vmax.f32 %v3059_v52, %v3063_v56  ;;  %v3065_v35 = vsel %vm3033_vm7, %v2984_v33, -inf  ;;  %v3064_v59 = vsel %vm3032_vm13, %v2880_v3, -inf  ;;  %v2986_v63 = vpop.f32.mrb[27].mxu0 }
 0x54c   :  { %v3099_v10 = vmax.f32 %v3083_v23, %v3085_v28  ;;  %v3089_v57 = vmax.f32 %v3061_v16, %v3065_v35  ;;  %v3088_v36 = vmax.f32 %v3060_v17, %v3064_v59  ;;  %v3066_v37 = vsel %vm3034_vm14, %v2986_v63, -inf }
 0x54d   :  { %v3100_v38 = vmax.f32 %v3084_v29, %v3086_v40  ;;  %v3090_v39 = vmax.f32 %v3062_v22, %v3066_v37  ;;  %vm3048_vm0 = vcmp.lt.s32.totalorder %v4499_v2, %v4507_v12  ;;  %vm3050_vm7 = vcmp.lt.s32.totalorder %v4502_v8, %v4507_v12  ;;  %v3603_v2 = vld [vmem:[%s4684_s9] ss:$0 sm:$0xff]  ;;  %s3973_s9 = scalar_lea.vmem %s3253_s6, 512 }
 0x54e   :  { %vm4689_vm13 = vcmp.lt.s32.totalorder %v4259_v55, %v4504_v11  ;;  %v3069_v9 = vsel %vm4690_vm4, %v4476_v19, -inf  ;;  %vm4691_vm14 = vcmp.lt.s32.totalorder %v4268_v62, %v4504_v11  ;;  %v3101_v43 = vmax.f32 %v3087_v34, %v3089_v57  ;;  %p3974_p12 = scmp.ne.s32.totalorder %s3253_s6, %s3973_s9  ;;  %p3979_p0 = scmp.lt.s32.totalorder %s3973_s9, %s3973_s9 }
 0x54f   :  { %v3067_v6 = vsel %vm4689_vm13, %v4474_v46, -inf  ;;  %v3068_v42 = vsel %vm4691_vm14, %v4478_v51, -inf  ;;  %vm4692_vm6 = vcmp.lt.s32.totalorder %v4271_v41, %v4504_v11  ;;  %vm4693_vm11 = vcmp.lt.s32.totalorder %v4259_v55, %v4507_v12  ;;  %v2884_v48 = vpop.f32.mrb[20].mxu1 }
 0x550   :  { %v3070_v47 = vsel %vm4692_vm6, %v4480_v18, -inf  ;;  %v3075_v44 = vsel %vm4693_vm11, %v4482_v14, -inf  ;;  %v3102_v45 = vmax.f32 %v3088_v36, %v3090_v39  ;;  %v3107_v49 = vmax.f32 %v3099_v10, %v3100_v38  ;;  %v2990_v51 = vpop.f32.mrb[28].mxu0  ;;  %v2886_v18 = vpop.f32.mrb[21].mxu1  ;;  %p3980_p1 = por %p3979_p0, %p3978_p13 }
 0x551   :  { %v3076_v46 = vsel %vm3044_vm9, %v4486_v7, -inf  ;;  %v3078_v19 = vsel %vm3046_vm15, %v4488_v60, -inf  ;;  %v3071_v55 = vsel %vm3039_vm1, %v2884_v48, -inf  ;;  %v3073_v58 = vsel %vm3041_vm2, %v2990_v51, -inf  ;;  %v2992_v1 = vpop.f32.mrb[29].mxu0  ;;  %v2888_v7 = vpop.f32.mrb[22].mxu1 }
 0x552   :  { %v3091_v14 = vmax.f32 %v3067_v6, %v3071_v55  ;;  %v3072_v62 = vsel %vm3040_vm3, %v2886_v18, -inf  ;;  %v3108_v61 = vmax.f32 %v3101_v43, %v3102_v45  ;;  %v3093_v41 = vmax.f32 %v3069_v9, %v3073_v58  ;;  %v2994_v15 = vpop.f32.mrb[30].mxu0  ;;  %v2890_v31 = vpop.f32.mrb[23].mxu1  ;;  %p3981_p2 = pnand %p3980_p1, %p3974_p12 }
 0x553   :  { %v3092_v60 = vmax.f32 %v3068_v42, %v3072_v62  ;;  %v3074_v50 = vsel %vm3042_vm5, %v2992_v1, -inf  ;;  %v3079_v5 = vsel %vm3047_vm10, %v2888_v7, -inf  ;;  %v3081_v52 = vsel %vm3049_vm12, %v2994_v15, -inf  ;;  %v2996_v17 = vpop.f32.mrb[31].mxu0 }
 0x554   :  { %v3094_v32 = vmax.f32 %v3070_v47, %v3074_v50  ;;  %v3095_v53 = vmax.f32 %v3075_v44, %v3079_v5  ;;  %v3080_v16 = vsel %vm3048_vm0, %v2890_v31, -inf  ;;  %v3103_v20 = vmax.f32 %v3091_v14, %v3093_v41 }
 0x555   :  { %v3097_v11 = vmax.f32 %v3077_v4, %v3081_v52  ;;  %v3096_v21 = vmax.f32 %v3076_v46, %v3080_v16  ;;  %v3082_v0 = vsel %vm3050_vm7, %v2996_v17, -inf }
 0x556   :  { %v3104_v13 = vmax.f32 %v3092_v60, %v3094_v32  ;;  %v3098_v22 = vmax.f32 %v3078_v19, %v3082_v0 }
 0x557   :  { %v3105_v23 = vmax.f32 %v3095_v53, %v3097_v11 }
 0x558   :  { %v3106_v24 = vmax.f32 %v3096_v21, %v3098_v22  ;;  %v3109_v25 = vmax.f32 %v3103_v20, %v3104_v13 }
 0x55a   :  { %v3110_v26 = vmax.f32 %v3105_v23, %v3106_v24 }
 0x568   :  { %v3632_v54 = vpop.f32.mrb[24].mxu1 }
 0x569   :  { %v3226_v27 = vadd.f32 %v3632_v54, %v3109_v25  ;;  %v3209_v28 = vpop.f32.mrb[25].mxu1 }
 0x56a   :  { %v3224_v29 = vadd.f32 %v3209_v28, %v3107_v49  ;;  %v3633_v30 = vpop.f32.mrb[26].mxu1 }
 0x56b   :  { %v3237_v56 = vadd.f32 %v3603_v2, %v3226_v27  ;;  %v3227_v33 = vadd.f32 %v3633_v30, %v3110_v26  ;;  %v3212_v3 = vpop.f32.mrb[27].mxu1 }
 0x56c   :  { %v3235_v8 = vadd.f32 %v3603_v2, %v3224_v29  ;;  %v3225_v12 = vadd.f32 %v3212_v3, %v3108_v61 }
 0x56d   :  { %v3241_v40 = vmax.f32 %v3237_v56, 0.0  ;;  %v3238_v34 = vadd.f32 %v3603_v2, %v3227_v33 }
 0x56e   :  { %v3239_v35 = vmax.f32 %v3235_v8, 0.0  ;;  %v3236_v59 = vadd.f32 %v3603_v2, %v3225_v12 }
 0x56f   :  { %3245 = vst [vmem:[#allocation11 + $0x10] sm:$0xff] %v3241_v40  ;;  %v3242_v63 = vmax.f32 %v3238_v34, 0.0 }
 0x570   :  { %3243 = vst [vmem:[#allocation11] sm:$0xff] %v3239_v35  ;;  %v3240_v10 = vmax.f32 %v3236_v59, 0.0 }
 0x571   :  { %3246 = vst [vmem:[#allocation11 + $0x18] sm:$0xff] %v3242_v63 }
 0x572   :  { %3244 = vst [vmem:[#allocation11 + $0x8] sm:$0xff] %v3240_v10 }
 0x573   :  { %3984 = shalt.err (!%p3981_p2)
}
 0x574   :  { %s3985_s25 = scalar_lea.hbm %s4685_s10, 512 }
 0x575   :  { %p3986_p3 = scmp.ne.s32.totalorder %s4685_s10, %s3985_s25  ;;  %p3989_p4 = scmp.lt.u32.totalorder %s3985_s25, %s4685_s10 }
 0x577   :  { %p3991_p5 = pnand %p3989_p4, %p3986_p3 }
 0x579   :  { %3994 = shalt.err (!%p3991_p5)
}
 0x57a   :  { %s4016_s21 = smov 128   ;;  %s4017_s30 = smov 8  }
 0x57b   :  { %3258 = dma.vmem_to_hbm [thread:$0]  %s3253_s6, 512, %s4685_s10, [#allocation4], %s4016_s21, %s4016_s21, %s4017_s30  }
 0x57c   :  { %4001 = dma.done.wait [#allocation4], 512  }
 0x57d   :  { %4002 = vsyncadd [#allocation4], 4294966784 }
 0x57e   :  { %3262 = vsyncpa [#allocation3], 1 }
 0x57f   :  { %3263 = vsyncpa [#allocation6], 1 }
 0x580   :  { %3264 = vsyncpa [#allocation9], 1 }
 0x581   :  { %3265 = vsyncpa [#allocation4], 1 }

</bundles_post_ra>
